<compile_context>
chip_gen: v6e
topology: v6e:2x2x1
jax: 0.10.0
libtpu: 0.0.40
codegen_flags: <defaults>
</compile_context>

<pallas_src>
import jax
import jax.numpy as jnp
from jax import lax
from jax.experimental import pallas as pl
from jax.experimental.pallas import tpu as pltpu

IN_CHANNELS = 28 * 28          # 784 (logical feature dim)
MID_CHANNELS = 64              # logical hidden dim
NUM_BLOCKS = 3

C_PAD = 896                    # 7 * 128 lane-dense feature dim
W_COLS = 2 * MID_CHANNELS      # 128: [ W1 | W2^T ] packed per block
MAX_BATCH_TILE = 256           # rows per grid step (VMEM-safe on v7x 64 MiB)


def _round_up(x, m):
    return ((x + m - 1) // m) * m


def _glow_fused_kernel(x_ref, w_ref, b1_ref, b2_ref, o_ref):
    """One grid step = one batch tile pushed through all NUM_BLOCKS GlowBlocks.

    x_ref : (BT, C_PAD)               f32   activation tile
    w_ref : (NUM_BLOCKS, C_PAD, 128)  bf16  packed [W1 | W2^T] per block
    b1_ref: (NUM_BLOCKS, 1, MID)      f32
    b2_ref: (NUM_BLOCKS, 1, C_PAD)    f32
    o_ref : (BT, C_PAD)               f32
    """
    x = x_ref[...]
    for k in range(NUM_BLOCKS):                     # static unroll (3 blocks)
        w = w_ref[k]                                 # (C_PAD, 128) bf16, VMEM-resident
        xb = x.astype(jnp.bfloat16)
        # Linear 1: bf16 operands, f32 MXU accumulation; bias + ReLU in f32.
        h = jnp.dot(xb, w[:, :MID_CHANNELS],
                    preferred_element_type=jnp.float32)
        h = jnp.maximum(h + b1_ref[k], 0.0)
        # Linear 2: contract against the stored W2^T (trans-B, q@k^T style).
        y = lax.dot_general(h.astype(jnp.bfloat16), w[:, MID_CHANNELS:],
                            (((1,), (1,)), ((), ())),
                            preferred_element_type=jnp.float32)
        x = y + b2_ref[k]
    o_ref[...] = x.astype(o_ref.dtype)


@jax.jit
def glow_forward(x, packed_params):
    """x: [B, 784] f32; packed_params: (wps bf16, b1s f32, b2s f32)."""
    wps, b1s, b2s = packed_params
    B, C = x.shape
    bt = MAX_BATCH_TILE if B > MAX_BATCH_TILE else _round_up(max(B, 1), 8)
    B_pad = _round_up(B, bt)

    # Zero-pad batch and feature dims once (padding invariant is exact).
    x_pad = jnp.zeros((B_pad, C_PAD), jnp.float32).at[:B, :C].set(x)

    cost = pl.CostEstimate(
        flops=2 * NUM_BLOCKS * B_pad * 2 * C_PAD * MID_CHANNELS,
        transcendentals=0,
        bytes_accessed=(NUM_BLOCKS * C_PAD * W_COLS * 2                # bf16 weights
                        + NUM_BLOCKS * (MID_CHANNELS + C_PAD) * 4      # f32 biases
                        + 2 * B_pad * C_PAD * 4),                      # activations
    )

    out = pl.pallas_call(
        _glow_fused_kernel,
        out_shape=jax.ShapeDtypeStruct((B_pad, C_PAD), jnp.float32),
        grid_spec=pltpu.PrefetchScalarGridSpec(
            num_scalar_prefetch=0,
            grid=(B_pad // bt,),
            in_specs=[
                # activation batch tile, streamed per grid step
                pl.BlockSpec((bt, C_PAD), lambda i: (i, 0)),
                # packed weights / biases: constant block index -> DMA'd once,
                # stay VMEM-resident across all batch tiles
                pl.BlockSpec((NUM_BLOCKS, C_PAD, W_COLS), lambda i: (0, 0, 0)),
                pl.BlockSpec((NUM_BLOCKS, 1, MID_CHANNELS), lambda i: (0, 0, 0)),
                pl.BlockSpec((NUM_BLOCKS, 1, C_PAD), lambda i: (0, 0, 0)),
            ],
            out_specs=pl.BlockSpec((bt, C_PAD), lambda i: (i, 0)),
        ),
        input_output_aliases={0: 0},   # reuse padded-x HBM buffer for the output
        cost_estimate=cost,
        compiler_params=pltpu.CompilerParams(
            # batch tiles are independent -> eligible for v7x megacore split
            dimension_semantics=("parallel",),
        ),
    )(x_pad, wps, b1s, b2s)

    return out[:B, :C]


def init_glow_params(key, num_blocks=NUM_BLOCKS, in_c=IN_CHANNELS, mid_c=MID_CHANNELS):
    """Deterministic PyTorch-style (Kaiming-uniform-ish) init of all block params."""
    params = []
    for _ in range(num_blocks):
        k1, k2, k3, k4, key = jax.random.split(key, 5)
        bound1 = 1.0 / jnp.sqrt(in_c)
        bound2 = 1.0 / jnp.sqrt(mid_c)
        # stored pre-transposed: w1 [in, mid], w2 [mid, in]; biases as [1, dim]
        w1 = jax.random.uniform(k1, (in_c, mid_c), jnp.float32, -bound1, bound1)
        b1 = jax.random.uniform(k2, (1, mid_c), jnp.float32, -bound1, bound1)
        w2 = jax.random.uniform(k3, (mid_c, in_c), jnp.float32, -bound2, bound2)
        b2 = jax.random.uniform(k4, (1, in_c), jnp.float32, -bound2, bound2)
        params.append((w1, b1, w2, b2))
    return params


def pack_glow_params(params):
    """Pack each block's W1 and W2^T into one lane-dense (C_PAD, 128) bf16 tile."""
    wps = jnp.zeros((NUM_BLOCKS, C_PAD, W_COLS), jnp.float32)
    b1s = jnp.zeros((NUM_BLOCKS, 1, MID_CHANNELS), jnp.float32)
    b2s = jnp.zeros((NUM_BLOCKS, 1, C_PAD), jnp.float32)
    for i, (w1, b1, w2, b2) in enumerate(params):
        wps = wps.at[i, :IN_CHANNELS, :MID_CHANNELS].set(w1)      # W1    [784, 64]
        wps = wps.at[i, :IN_CHANNELS, MID_CHANNELS:].set(w2.T)    # W2^T  [784, 64]
        b1s = b1s.at[i, :, :].set(b1)
        b2s = b2s.at[i, :, :IN_CHANNELS].set(b2)
    return (wps.astype(jnp.bfloat16), b1s, b2s)


def glow_forward_ref(x, params, weight_dtype=jnp.float32):
    """Plain-JAX reference; weight_dtype=bfloat16 mimics the kernel's operand cast."""
    for (w1, b1, w2, b2) in params:
        h = jnp.dot(x.astype(weight_dtype), w1.astype(weight_dtype),
                    preferred_element_type=jnp.float32) + b1
        h = jnp.maximum(h, 0.0)
        x = jnp.dot(h.astype(weight_dtype), w2.astype(weight_dtype),
                    preferred_element_type=jnp.float32) + b2
    return x


if __name__ == "__main__":
    key = jax.random.PRNGKey(0)
    kx, kp = jax.random.split(key)

    batch = 8
    x = jax.random.normal(kx, (batch, IN_CHANNELS), jnp.float32)
    params = init_glow_params(kp)
    packed = pack_glow_params(params)

    out = jax.block_until_ready(glow_forward(x, packed))
    assert out.shape == (batch, IN_CHANNELS)

    # Primary check: reference with the same bf16 operand rounding (f32 accum).
    ref_bf16 = glow_forward_ref(x, params, weight_dtype=jnp.bfloat16)
    assert jnp.allclose(out, ref_bf16, atol=1e-3, rtol=1e-2), \
        float(jnp.max(jnp.abs(out - ref_bf16)))

    # Sanity check vs the full-f32 PyTorch-equivalent math (bf16 drift only).
    ref_f32 = glow_forward_ref(x, params, weight_dtype=jnp.float32)
    assert jnp.allclose(out, ref_f32, atol=3e-2, rtol=3e-2), \
        float(jnp.max(jnp.abs(out - ref_f32)))

    print("KERNEL_OK")
</pallas_src>

<mosaic_0001>
module attributes {stable_mosaic.version = 11 : i64} {
  func.func @_glow_fused_kernel(%arg0: i32, %arg1: memref<8x896xf32, #tpu.memory_space<vmem>>, %arg2: memref<3x896x128xbf16, #tpu.memory_space<vmem>>, %arg3: memref<3x1x64xf32, #tpu.memory_space<vmem>>, %arg4: memref<3x1x896xf32, #tpu.memory_space<vmem>>, %arg5: memref<8x896xf32, #tpu.memory_space<vmem>>) attributes {dimension_semantics = [#tpu.dimension_semantics<parallel>], iteration_bounds = array<i64: 1>, scalar_prefetch = 0 : i64, scratch_operands = 0 : i64, tpu.core_type = #tpu.core_type<tc>, window_params = [{transform_indices = @transform_0, window_bounds = array<i64: 8, 896>}, {pipeline_mode = #tpu.pipeline_mode<synchronous>, transform_indices = @transform_1, window_bounds = array<i64: 3, 896, 128>}, {pipeline_mode = #tpu.pipeline_mode<synchronous>, transform_indices = @transform_2, window_bounds = array<i64: 3, 1, 64>}, {pipeline_mode = #tpu.pipeline_mode<synchronous>, transform_indices = @transform_3, window_bounds = array<i64: 3, 1, 896>}, {transform_indices = @transform_4, window_bounds = array<i64: 8, 896>}]} {
    %c0 = arith.constant 0 : index
    %c0_0 = arith.constant 0 : index
    %0 = vector.load %arg1[%c0, %c0_0] : memref<8x896xf32, #tpu.memory_space<vmem>>, vector<8x896xf32>
    %c0_1 = arith.constant 0 : index
    %c0_2 = arith.constant 0 : index
    %c0_3 = arith.constant 0 : index
    %1 = vector.load %arg2[%c0_1, %c0_2, %c0_3] : memref<3x896x128xbf16, #tpu.memory_space<vmem>>, vector<1x896x128xbf16>
    %2 = vector.shape_cast %1 : vector<1x896x128xbf16> to vector<896x128xbf16>
    %3 = arith.truncf %0 : vector<8x896xf32> to vector<8x896xbf16>
    %4 = vector.extract_strided_slice %2 {offsets = [0, 0], sizes = [896, 64], strides = [1, 1]} : vector<896x128xbf16> to vector<896x64xbf16>
    %cst = arith.constant dense<0.000000e+00> : vector<8x64xf32>
    %5 = tpu.matmul %3, %4, %cst {dimension_numbers = #tpu.dot_dimension_numbers<[1], [0], [0], [1], [0, 0, 1, 1], [], []>} : vector<8x896xbf16>, vector<896x64xbf16>, vector<8x64xf32> -> vector<8x64xf32>
    %c0_4 = arith.constant 0 : index
    %c0_5 = arith.constant 0 : index
    %c0_6 = arith.constant 0 : index
    %6 = vector.load %arg3[%c0_4, %c0_5, %c0_6] : memref<3x1x64xf32, #tpu.memory_space<vmem>>, vector<1x1x64xf32>
    %7 = vector.shape_cast %6 : vector<1x1x64xf32> to vector<1x64xf32>
    %8 = vector.broadcast %7 : vector<1x64xf32> to vector<8x64xf32>
    %9 = arith.addf %5, %8 : vector<8x64xf32>
    %cst_7 = arith.constant 0.000000e+00 : f32
    %10 = vector.broadcast %cst_7 : f32 to vector<8x64xf32>
    %11 = arith.maximumf %9, %10 : vector<8x64xf32>
    %12 = arith.truncf %11 : vector<8x64xf32> to vector<8x64xbf16>
    %13 = vector.extract_strided_slice %2 {offsets = [0, 64], sizes = [896, 64], strides = [1, 1]} : vector<896x128xbf16> to vector<896x64xbf16>
    %cst_8 = arith.constant dense<0.000000e+00> : vector<8x896xf32>
    %14 = tpu.matmul %12, %13, %cst_8 {dimension_numbers = #tpu.dot_dimension_numbers<[1], [1], [0], [0], [0, 0, 1, 0], [], []>} : vector<8x64xbf16>, vector<896x64xbf16>, vector<8x896xf32> -> vector<8x896xf32>
    %c0_9 = arith.constant 0 : index
    %c0_10 = arith.constant 0 : index
    %c0_11 = arith.constant 0 : index
    %15 = vector.load %arg4[%c0_9, %c0_10, %c0_11] : memref<3x1x896xf32, #tpu.memory_space<vmem>>, vector<1x1x896xf32>
    %16 = vector.shape_cast %15 : vector<1x1x896xf32> to vector<1x896xf32>
    %17 = vector.broadcast %16 : vector<1x896xf32> to vector<8x896xf32>
    %18 = arith.addf %14, %17 : vector<8x896xf32>
    %c1 = arith.constant 1 : index
    %c0_12 = arith.constant 0 : index
    %c0_13 = arith.constant 0 : index
    %19 = vector.load %arg2[%c1, %c0_12, %c0_13] : memref<3x896x128xbf16, #tpu.memory_space<vmem>>, vector<1x896x128xbf16>
    %20 = vector.shape_cast %19 : vector<1x896x128xbf16> to vector<896x128xbf16>
    %21 = arith.truncf %18 : vector<8x896xf32> to vector<8x896xbf16>
    %22 = vector.extract_strided_slice %20 {offsets = [0, 0], sizes = [896, 64], strides = [1, 1]} : vector<896x128xbf16> to vector<896x64xbf16>
    %cst_14 = arith.constant dense<0.000000e+00> : vector<8x64xf32>
    %23 = tpu.matmul %21, %22, %cst_14 {dimension_numbers = #tpu.dot_dimension_numbers<[1], [0], [0], [1], [0, 0, 1, 1], [], []>} : vector<8x896xbf16>, vector<896x64xbf16>, vector<8x64xf32> -> vector<8x64xf32>
    %c1_15 = arith.constant 1 : index
    %c0_16 = arith.constant 0 : index
    %c0_17 = arith.constant 0 : index
    %24 = vector.load %arg3[%c1_15, %c0_16, %c0_17] : memref<3x1x64xf32, #tpu.memory_space<vmem>>, vector<1x1x64xf32>
    %25 = vector.shape_cast %24 : vector<1x1x64xf32> to vector<1x64xf32>
    %26 = vector.broadcast %25 : vector<1x64xf32> to vector<8x64xf32>
    %27 = arith.addf %23, %26 : vector<8x64xf32>
    %cst_18 = arith.constant 0.000000e+00 : f32
    %28 = vector.broadcast %cst_18 : f32 to vector<8x64xf32>
    %29 = arith.maximumf %27, %28 : vector<8x64xf32>
    %30 = arith.truncf %29 : vector<8x64xf32> to vector<8x64xbf16>
    %31 = vector.extract_strided_slice %20 {offsets = [0, 64], sizes = [896, 64], strides = [1, 1]} : vector<896x128xbf16> to vector<896x64xbf16>
    %cst_19 = arith.constant dense<0.000000e+00> : vector<8x896xf32>
    %32 = tpu.matmul %30, %31, %cst_19 {dimension_numbers = #tpu.dot_dimension_numbers<[1], [1], [0], [0], [0, 0, 1, 0], [], []>} : vector<8x64xbf16>, vector<896x64xbf16>, vector<8x896xf32> -> vector<8x896xf32>
    %c1_20 = arith.constant 1 : index
    %c0_21 = arith.constant 0 : index
    %c0_22 = arith.constant 0 : index
    %33 = vector.load %arg4[%c1_20, %c0_21, %c0_22] : memref<3x1x896xf32, #tpu.memory_space<vmem>>, vector<1x1x896xf32>
    %34 = vector.shape_cast %33 : vector<1x1x896xf32> to vector<1x896xf32>
    %35 = vector.broadcast %34 : vector<1x896xf32> to vector<8x896xf32>
    %36 = arith.addf %32, %35 : vector<8x896xf32>
    %c2 = arith.constant 2 : index
    %c0_23 = arith.constant 0 : index
    %c0_24 = arith.constant 0 : index
    %37 = vector.load %arg2[%c2, %c0_23, %c0_24] : memref<3x896x128xbf16, #tpu.memory_space<vmem>>, vector<1x896x128xbf16>
    %38 = vector.shape_cast %37 : vector<1x896x128xbf16> to vector<896x128xbf16>
    %39 = arith.truncf %36 : vector<8x896xf32> to vector<8x896xbf16>
    %40 = vector.extract_strided_slice %38 {offsets = [0, 0], sizes = [896, 64], strides = [1, 1]} : vector<896x128xbf16> to vector<896x64xbf16>
    %cst_25 = arith.constant dense<0.000000e+00> : vector<8x64xf32>
    %41 = tpu.matmul %39, %40, %cst_25 {dimension_numbers = #tpu.dot_dimension_numbers<[1], [0], [0], [1], [0, 0, 1, 1], [], []>} : vector<8x896xbf16>, vector<896x64xbf16>, vector<8x64xf32> -> vector<8x64xf32>
    %c2_26 = arith.constant 2 : index
    %c0_27 = arith.constant 0 : index
    %c0_28 = arith.constant 0 : index
    %42 = vector.load %arg3[%c2_26, %c0_27, %c0_28] : memref<3x1x64xf32, #tpu.memory_space<vmem>>, vector<1x1x64xf32>
    %43 = vector.shape_cast %42 : vector<1x1x64xf32> to vector<1x64xf32>
    %44 = vector.broadcast %43 : vector<1x64xf32> to vector<8x64xf32>
    %45 = arith.addf %41, %44 : vector<8x64xf32>
    %cst_29 = arith.constant 0.000000e+00 : f32
    %46 = vector.broadcast %cst_29 : f32 to vector<8x64xf32>
    %47 = arith.maximumf %45, %46 : vector<8x64xf32>
    %48 = arith.truncf %47 : vector<8x64xf32> to vector<8x64xbf16>
    %49 = vector.extract_strided_slice %38 {offsets = [0, 64], sizes = [896, 64], strides = [1, 1]} : vector<896x128xbf16> to vector<896x64xbf16>
    %cst_30 = arith.constant dense<0.000000e+00> : vector<8x896xf32>
    %50 = tpu.matmul %48, %49, %cst_30 {dimension_numbers = #tpu.dot_dimension_numbers<[1], [1], [0], [0], [0, 0, 1, 0], [], []>} : vector<8x64xbf16>, vector<896x64xbf16>, vector<8x896xf32> -> vector<8x896xf32>
    %c2_31 = arith.constant 2 : index
    %c0_32 = arith.constant 0 : index
    %c0_33 = arith.constant 0 : index
    %51 = vector.load %arg4[%c2_31, %c0_32, %c0_33] : memref<3x1x896xf32, #tpu.memory_space<vmem>>, vector<1x1x896xf32>
    %52 = vector.shape_cast %51 : vector<1x1x896xf32> to vector<1x896xf32>
    %53 = vector.broadcast %52 : vector<1x896xf32> to vector<8x896xf32>
    %54 = arith.addf %50, %53 : vector<8x896xf32>
    %c0_34 = arith.constant 0 : index
    %c0_35 = arith.constant 0 : index
    %55 = vector.load %arg5[%c0_34, %c0_35] : memref<8x896xf32, #tpu.memory_space<vmem>>, vector<8x896xf32>
    tpu.vector_store %arg5[%c0_34, %c0_35], %54 {strides = array<i32>} : memref<8x896xf32, #tpu.memory_space<vmem>>, vector<8x896xf32>,
    return
  }
  func.func @transform_0(%arg0: i32) -> (i32, i32) {
    %c0_i32 = arith.constant 0 : i32
    %c0_i32_0 = arith.constant 0 : i32
    return %arg0, %c0_i32 : i32, i32
  }
  func.func @transform_1(%arg0: i32) -> (i32, i32, i32) {
    %c0_i32 = arith.constant 0 : i32
    %c0_i32_0 = arith.constant 0 : i32
    %c0_i32_1 = arith.constant 0 : i32
    %c0_i32_2 = arith.constant 0 : i32
    return %c0_i32, %c0_i32_0, %c0_i32_1 : i32, i32, i32
  }
  func.func @transform_2(%arg0: i32) -> (i32, i32, i32) {
    %c0_i32 = arith.constant 0 : i32
    %c0_i32_0 = arith.constant 0 : i32
    %c0_i32_1 = arith.constant 0 : i32
    %c0_i32_2 = arith.constant 0 : i32
    return %c0_i32, %c0_i32_0, %c0_i32_1 : i32, i32, i32
  }
  func.func @transform_3(%arg0: i32) -> (i32, i32, i32) {
    %c0_i32 = arith.constant 0 : i32
    %c0_i32_0 = arith.constant 0 : i32
    %c0_i32_1 = arith.constant 0 : i32
    %c0_i32_2 = arith.constant 0 : i32
    return %c0_i32, %c0_i32_0, %c0_i32_1 : i32, i32, i32
  }
  func.func @transform_4(%arg0: i32) -> (i32, i32) {
    %c0_i32 = arith.constant 0 : i32
    %c0_i32_0 = arith.constant 0 : i32
    return %arg0, %c0_i32 : i32, i32
  }
}

</mosaic_0001>

<bundles_post_ra>
// kernel: glow_forward.1
= control target key start
LH: loop header
LB: loop body
LE: loop exit
PB: predicated region body
PF: predicated region fallthrough
CT: control target
= control target key end

     0   :  { %9 = vsyncpa [#allocation3], 0  ;;  %s4367_s15 = smov [#allocation2]   ;;  %s5405_s0 = inlined_call_operand.vmem [shape: f32[8,896], index: 0, kind: input, shape index: {}, may-alias: {0,4}]   ;;  %s5406_s1 = inlined_call_operand.hbm [shape: bf16[3,896,128], index: 1, kind: input, shape index: {}]   ;;  %s5407_s2 = inlined_call_operand.vmem [shape: f32[3,1,64], index: 2, kind: input, shape index: {}]   ;;  %s5408_s3 = inlined_call_operand.vmem [shape: f32[3,1,896], index: 3, kind: input, shape index: {}]   ;;  %s5409_s4 = inlined_call_operand.vmem [shape: f32[8,896], index: 4, kind: output, shape index: {}, may-alias: {0,4}]  }
   0x1   :  { %s17_s16 = sshll.u32 %s4367_s15, 4  ;;  %s18_s16 = int_to_ptr.vmem [resolvable:$true] %s17_s16 }
   0x2   :  { %s4353_s17 = scalar_lea.vmem %s18_s16, 21504  ;;  %p4358_p1 = scmp.lt.s32.totalorder %s18_s16, %s18_s16 }
   0x3   :  { %p4354_p0 = scmp.ne.s32.totalorder %s18_s16, %s4353_s17  ;;  %p4359_p2 = scmp.lt.s32.totalorder %s4353_s17, %s4353_s17 }
   0x5   :  { %p4360_p3 = por %p4359_p2, %p4358_p1 }
   0x7   :  { %p4361_p4 = pnand %p4360_p3, %p4354_p0 }
   0x9   :  { %4364 = shalt.err (!%p4361_p4)
}
   0xa   :  { %s4368_s18 = smov 64   ;;  %s4369_s19 = smov 4  }
   0xb   :  { %23 = dma.hbm_to_vmem [thread:$0]  %s5406_s1, 21504, %s18_s16, [#allocation3], %s4368_s18, %s4368_s18, %s4369_s19  }
   0xc   :  { %4365 = dma.done.wait [#allocation3], 21504  }
   0xd   :  { %4366 = vsyncadd [#allocation3], 4294945792  ;;  %v4177_v0 = vld [vmem:[#allocation2 + $0x78] sm:$0xff]   ;;  %v4181_v4 = vld [vmem:[#allocation2 + $0x70] sm:$0xff]   ;;  %v4370_v39 = vmov 0.0   ;;  %vm4371_vm0 = vmmov 0  }
   0xe   :  { %v4178_v1 = vld [vmem:[#allocation2 + $0xf8] sm:$0xff]   ;;  %3566 = vmatprep.subr.bf16.mxu0 %v4177_v0  ;;  %v4182_v5 = vld [vmem:[#allocation2 + $0xf0] sm:$0xff]   ;;  %v4185_v8 = vld [vmem:[#allocation2 + $0x68] sm:$0xff]   ;;  %vm812_vm1 = vcmask 523264  }
   0xf   :  { %v4179_v2 = vld [vmem:[#allocation2 + $0x38] sm:$0xff]   ;;  %3588 = vmatprep.subr.bf16.mxu1 %v4178_v1  ;;  %v4183_v6 = vld [vmem:[#allocation2 + $0x30] sm:$0xff]   ;;  %v4186_v9 = vld [vmem:[#allocation2 + $0xe8] sm:$0xff]  }
  0x10   :  { %v4180_v3 = vld [vmem:[#allocation2 + $0xb8] sm:$0xff]   ;;  %3567 = vmatpush3.bf16.msra.mxu0 %v4179_v2  ;;  %714 = vrot.lane.b32.xlu0 %v4179_v2, %s4368_s18  ;;  %v4184_v7 = vld [vmem:[#allocation2 + $0xb0] sm:$0xff]   ;;  %v4187_v10 = vld [vmem:[#allocation2 + $0x28] sm:$0xff]  }
  0x11   :  { %3589 = vmatpush3.bf16.msra.mxu1 %v4180_v3  ;;  %3568 = vmatprep.subr.bf16.mxu0 %v4181_v4  ;;  %v4188_v11 = vld [vmem:[#allocation2 + $0xa8] sm:$0xff]   ;;  %v4189_v12 = vld [vmem:[#allocation2 + $0x60] sm:$0xff]   ;;  %v4412_v16 = vld [vmem:[#allocation2 + $0x58] sm:$0xff]  }
  0x12   :  { %3590 = vmatprep.subr.bf16.mxu1 %v4182_v5  ;;  %712 = vrot.lane.b32.xlu1 %v4183_v6, %s4368_s18  ;;  %v4406_v13 = vld [vmem:[#allocation2 + $0xe0] sm:$0xff]   ;;  %v4416_v17 = vld [vmem:[#allocation2 + $0xd8] sm:$0xff]   ;;  %v4423_v20 = vld [vmem:[#allocation2 + $0x50] sm:$0xff]  }
  0x13   :  { %v4191_v14 = vld [vmem:[#allocation2 + $0x20] sm:$0xff]   ;;  %v4195_v18 = vld [vmem:[#allocation2 + $0x18] sm:$0xff]   ;;  %v4427_v21 = vld [vmem:[#allocation2 + $0xd0] sm:$0xff]  }
  0x14   :  { %3569 = vmatpush3.bf16.msra.mxu0 %v4183_v6  ;;  %730 = vrot.lane.b32.xlu0 %v4177_v0, %s4368_s18  ;;  %v4410_v15 = vld [vmem:[#allocation2 + $0xa0] sm:$0xff]   ;;  %v4421_v19 = vld [vmem:[#allocation2 + $0x98] sm:$0xff]   ;;  %v4431_v22 = vld [vmem:[#allocation2 + $0x10] sm:$0xff]  }
  0x15   :  { %3591 = vmatpush3.bf16.msra.mxu1 %v4184_v7  ;;  %3570 = vmatprep.subr.bf16.mxu0 %v4185_v8  ;;  %v4434_v23 = vld [vmem:[#allocation2 + $0x90] sm:$0xff]   ;;  %v4437_v24 = vld [vmem:[#allocation2 + $0x48] sm:$0xff]   ;;  %v4451_v28 = vld [vmem:[#allocation2 + $0x40] sm:$0xff]  }
  0x16   :  { %3592 = vmatprep.subr.bf16.mxu1 %v4186_v9  ;;  %728 = vrot.lane.b32.xlu1 %v4181_v4, %s4368_s18  ;;  %v4441_v25 = vld [vmem:[#allocation2 + $0xc8] sm:$0xff]   ;;  %v4455_v29 = vld [vmem:[#allocation2 + $0xc0] sm:$0xff]   ;;  %v35_v34 = vld [vmem:[%s5405_s0 + $0x18] sm:$0xff] }
  0x17   :  { %v4445_v26 = vld [vmem:[#allocation2 + $0x8] sm:$0xff]   ;;  %v4459_v30 = vld [vmem:[#allocation2] sm:$0xff]   ;;  %v154_v37 = vpack.c.bf16 %v35_v34, %v35_v34  ;;  %v4476_v38 = vld [vmem:[#allocation2 + $0x178] sm:$0xff]  }
  0x18   :  { %3571 = vmatpush3.bf16.msra.mxu0 %v4187_v10  ;;  %746 = vrot.lane.b32.xlu0 %v4180_v3, %s4368_s18  ;;  %v4448_v27 = vld [vmem:[#allocation2 + $0x88] sm:$0xff]   ;;  %v4462_v31 = vld [vmem:[#allocation2 + $0x80] sm:$0xff]   ;;  %v34_v40 = vld [vmem:[%s5405_s0 + $0x10] sm:$0xff] }
  0x19   :  { %3593 = vmatpush3.bf16.msra.mxu1 %v4188_v11  ;;  %3572 = vmatprep.subr.bf16.mxu0 %v4189_v12  ;;  %v33_v32 = vld [vmem:[%s5405_s0 + $0x8] sm:$0xff]  ;;  %v32_v33 = vld [vmem:[%s5405_s0] sm:$0xff]  ;;  %v153_v41 = vpack.c.bf16 %v34_v40, %v34_v40  ;;  %v4483_v42 = vld [vmem:[#allocation2 + $0x138] sm:$0xff]  }
  0x1a   :  { %3594 = vmatprep.subr.bf16.mxu1 %v4406_v13  ;;  %762 = vrot.lane.b32.xlu1 %v4178_v1, %s4368_s18  ;;  %v152_v35 = vpack.c.bf16 %v33_v32, %v33_v32  ;;  %v151_v36 = vpack.c.bf16 %v32_v33, %v32_v33  ;;  %v4486_v43 = vld [vmem:[#allocation2 + $0x1b8] sm:$0xff]   ;;  %v4489_v44 = vld [vmem:[#allocation2 + $0x170] sm:$0xff]   ;;  %v4500_v47 = vld [vmem:[#allocation2 + $0x168] sm:$0xff]  }
  0x1b   :  { %573 = vmatprep.mubr.bf16.mxu1 %v154_v37  ;;  %v4492_v45 = vld [vmem:[#allocation2 + $0x130] sm:$0xff]   ;;  %v4507_v48 = vld [vmem:[#allocation2 + $0x128] sm:$0xff]   ;;  %v4514_v50 = vld [vmem:[#allocation2 + $0x160] sm:$0xff]  }
  0x1c   :  { %3573 = vmatpush3.bf16.msra.mxu0 %v4191_v14  ;;  %710 = vrot.lane.b32.xlu0 %v4187_v10, %s4368_s18  ;;  %v4498_v46 = vld [vmem:[#allocation2 + $0x1b0] sm:$0xff]   ;;  %v4511_v49 = vld [vmem:[#allocation2 + $0x1a8] sm:$0xff]   ;;  %v4516_v51 = vld [vmem:[#allocation2 + $0x120] sm:$0xff]  }
  0x1d   :  { %3595 = vmatpush3.bf16.msra.mxu1 %v4410_v15  ;;  %3574 = vmatprep.subr.bf16.mxu0 %v4412_v16  ;;  %v4523_v52 = vld [vmem:[#allocation2 + $0x1a0] sm:$0xff]   ;;  %v4527_v53 = vld [vmem:[#allocation2 + $0x158] sm:$0xff]   ;;  %v4224_v56 = vld [vmem:[#allocation2 + $0x150] sm:$0xff]  }
  0x1e   :  { %3596 = vmatprep.subr.bf16.mxu1 %v4416_v17  ;;  %726 = vrot.lane.b32.xlu1 %v4185_v8, %s4368_s18  ;;  %v4222_v54 = vld [vmem:[#allocation2 + $0x118] sm:$0xff]   ;;  %v4225_v57 = vld [vmem:[#allocation2 + $0x110] sm:$0xff]   ;;  %v4227_v59 = vld [vmem:[#allocation2 + $0x148] sm:$0xff]  }
  0x1f   :  { %533 = vmatprep.mubr.bf16.mxu0 %v152_v35  ;;  %v4223_v55 = vld [vmem:[#allocation2 + $0x198] sm:$0xff]   ;;  %v4226_v58 = vld [vmem:[#allocation2 + $0x190] sm:$0xff]   ;;  %v4228_v60 = vld [vmem:[#allocation2 + $0x108] sm:$0xff]  }
  0x20   :  { %3575 = vmatpush3.bf16.msra.mxu0 %v4195_v18  ;;  %744 = vrot.lane.b32.xlu0 %v4184_v7, %s4368_s18  ;;  %v4229_v61 = vld [vmem:[#allocation2 + $0x188] sm:$0xff]   ;;  %v4230_v63 = vld [vmem:[#allocation2 + $0x140] sm:$0xff]   ;;  %v38_v4 = vld [vmem:[%s5405_s0 + $0x30] sm:$0xff] }
  0x21   :  { %3597 = vmatpush3.bf16.msra.mxu1 %v4421_v19  ;;  %3576 = vmatprep.subr.bf16.mxu0 %v4423_v20  ;;  %v37_v62 = vld [vmem:[%s5405_s0 + $0x28] sm:$0xff]  ;;  %v4231_v1 = vld [vmem:[#allocation2 + $0x100] sm:$0xff]   ;;  %v157_v6 = vpack.c.bf16 %v38_v4, %v38_v4 }
  0x22   :  { %3598 = vmatprep.subr.bf16.mxu1 %v4427_v21  ;;  %760 = vrot.lane.b32.xlu1 %v4182_v5, %s4368_s18  ;;  %v156_v0 = vpack.c.bf16 %v37_v62, %v37_v62  ;;  %v36_v2 = vld [vmem:[%s5405_s0 + $0x20] sm:$0xff]  ;;  %v4661_v62 = vld [vmem:[#allocation2 + $0x2b8] sm:$0xff]  }
  0x23   :  { %v4232_v3 = vld [vmem:[#allocation2 + $0x180] sm:$0xff]   ;;  %v155_v5 = vpack.c.bf16 %v36_v2, %v36_v2  ;;  %v4677_v2 = vld [vmem:[#allocation2 + $0x2b0] sm:$0xff]  }
  0x24   :  { %3577 = vmatpush3.bf16.msra.mxu0 %v4431_v22  ;;  %708 = vrot.lane.b32.xlu0 %v4191_v14, %s4368_s18 }
  0x25   :  { %3599 = vmatpush3.bf16.msra.mxu1 %v4434_v23  ;;  %3578 = vmatprep.subr.bf16.mxu0 %v4437_v24 }
  0x26   :  { %3600 = vmatprep.subr.bf16.mxu1 %v4441_v25  ;;  %724 = vrot.lane.b32.xlu1 %v4189_v12, %s4368_s18 }
  0x28   :  { %3579 = vmatpush3.bf16.msra.mxu0 %v4445_v26  ;;  %742 = vrot.lane.b32.xlu0 %v4188_v11, %s4368_s18 }
  0x29   :  { %3601 = vmatpush3.bf16.msra.mxu1 %v4448_v27  ;;  %3580 = vmatprep.subr.bf16.mxu0 %v4451_v28 }
  0x2a   :  { %3602 = vmatprep.subr.bf16.mxu1 %v4455_v29  ;;  %758 = vrot.lane.b32.xlu1 %v4186_v9, %s4368_s18 }
  0x2c   :  { %3581 = vmatpush3.bf16.msra.mxu0 %v4459_v30  ;;  %706 = vrot.lane.b32.xlu0 %v4195_v18, %s4368_s18 }
  0x2d   :  { %3603 = vmatpush3.bf16.msra.mxu1 %v4462_v31  ;;  %3610 = vmatprep.subr.bf16.mxu0 %v4476_v38 }
  0x2e   :  { %3980 = vmatprep.subr.bf16.mxu1 %v4370_v39  ;;  %722 = vrot.lane.b32.xlu1 %v4412_v16, %s4368_s18 }
  0x2f   :  { %534 = vmatmul.mubr.bf16.vlgmr.msra.gmra.mxu0 %v151_v36 }
  0x30   :  { %574 = vmatmul.mubr.bf16.vlgmr.msra.gmra.mxu1 %v153_v41  ;;  %3611 = vmatpush3.bf16.msra.mxu0 %v4483_v42 }
  0x31   :  { %3981 = vmatpush3.bf16.msra.mxu1 %v4486_v43  ;;  %3996 = vmatprep.mubr.msk.bf16.mxu1 %vm4371_vm0, %v4370_v39 }
  0x32   :  { %3612 = vmatprep.subr.bf16.mxu0 %v4489_v44  ;;  %3982 = vmatprep.subr.bf16.mxu1 %v4370_v39 }
  0x33   :  { %740 = vrot.lane.b32.xlu0 %v4410_v15, %s4368_s18  ;;  %756 = vrot.lane.b32.xlu1 %v4406_v13, %s4368_s18 }
  0x34   :  { %3613 = vmatpush3.bf16.msra.mxu0 %v4492_v45  ;;  %613 = vmatprep.mubr.bf16.mxu0 %v156_v0  ;;  %v4669_v0 = vld [vmem:[#allocation2 + $0x228] sm:$0xff]  }
  0x35   :  { %3983 = vmatpush3.bf16.msra.mxu1 %v4498_v46  ;;  %3614 = vmatprep.subr.bf16.mxu0 %v4500_v47 }
  0x36   :  { %3984 = vmatprep.subr.bf16.mxu1 %v4370_v39 }
  0x37   :  { %704 = vrot.lane.b32.xlu0 %v4431_v22, %s4368_s18  ;;  %720 = vrot.lane.b32.xlu1 %v4423_v20, %s4368_s18 }
  0x38   :  { %3615 = vmatpush3.bf16.msra.mxu0 %v4507_v48 }
  0x39   :  { %3985 = vmatpush3.bf16.msra.mxu1 %v4511_v49  ;;  %3616 = vmatprep.subr.bf16.mxu0 %v4514_v50 }
  0x3a   :  { %3986 = vmatprep.subr.bf16.mxu1 %v4370_v39 }
  0x3b   :  { %738 = vrot.lane.b32.xlu0 %v4421_v19, %s4368_s18  ;;  %754 = vrot.lane.b32.xlu1 %v4416_v17, %s4368_s18 }
  0x3c   :  { %3617 = vmatpush3.bf16.msra.mxu0 %v4516_v51 }
  0x3d   :  { %3987 = vmatpush3.bf16.msra.mxu1 %v4523_v52  ;;  %3618 = vmatprep.subr.bf16.mxu0 %v4527_v53 }
  0x3e   :  { %3988 = vmatprep.subr.bf16.mxu1 %v4370_v39 }
  0x3f   :  { %702 = vrot.lane.b32.xlu0 %v4445_v26, %s4368_s18  ;;  %718 = vrot.lane.b32.xlu1 %v4437_v24, %s4368_s18 }
  0x40   :  { %3619 = vmatpush3.bf16.msra.mxu0 %v4222_v54 }
  0x41   :  { %3989 = vmatpush3.bf16.msra.mxu1 %v4223_v55  ;;  %3620 = vmatprep.subr.bf16.mxu0 %v4224_v56 }
  0x42   :  { %3990 = vmatprep.subr.bf16.mxu1 %v4370_v39 }
  0x43   :  { %736 = vrot.lane.b32.xlu0 %v4434_v23, %s4368_s18  ;;  %752 = vrot.lane.b32.xlu1 %v4427_v21, %s4368_s18 }
  0x44   :  { %3621 = vmatpush3.bf16.msra.mxu0 %v4225_v57 }
  0x45   :  { %3991 = vmatpush3.bf16.msra.mxu1 %v4226_v58  ;;  %3622 = vmatprep.subr.bf16.mxu0 %v4227_v59 }
  0x46   :  { %3992 = vmatprep.subr.bf16.mxu1 %v4370_v39 }
  0x47   :  { %700 = vrot.lane.b32.xlu0 %v4459_v30, %s4368_s18  ;;  %716 = vrot.lane.b32.xlu1 %v4451_v28, %s4368_s18 }
  0x48   :  { %3623 = vmatpush3.bf16.msra.mxu0 %v4228_v60 }
  0x49   :  { %3993 = vmatpush3.bf16.msra.mxu1 %v4229_v61  ;;  %3624 = vmatprep.subr.bf16.mxu0 %v4230_v63 }
  0x4a   :  { %3994 = vmatprep.subr.bf16.mxu1 %v4370_v39 }
  0x4b   :  { %734 = vrot.lane.b32.xlu0 %v4448_v27, %s4368_s18  ;;  %750 = vrot.lane.b32.xlu1 %v4441_v25, %s4368_s18 }
  0x4c   :  { %3625 = vmatpush3.bf16.msra.mxu0 %v4231_v1 }
  0x4d   :  { %3995 = vmatpush3.bf16.msra.mxu1 %v4232_v3 }
  0x4f   :  { %614 = vmatmul.mubr.bf16.vlgmr.msra.gmra.mxu0 %v155_v5  ;;  %778 = vrot.lane.b32.xlu0 %v4483_v42, %s4368_s18 }
  0x50   :  { %3997 = vmatmul.mubr.bf16.vlgmr.msra.gmra.mxu1 %v157_v6  ;;  %794 = vrot.lane.b32.xlu1 %v4476_v38, %s4368_s18 }
  0x53   :  { %732 = vrot.lane.b32.xlu0 %v4462_v31, %s4368_s18 }
  0x54   :  { %748 = vrot.lane.b32.xlu1 %v4455_v29, %s4368_s18 }
  0x57   :  { %776 = vrot.lane.b32.xlu0 %v4492_v45, %s4368_s18 }
  0x58   :  { %792 = vrot.lane.b32.xlu1 %v4489_v44, %s4368_s18 }
  0x5b   :  { %810 = vrot.lane.b32.xlu0 %v4486_v43, %s4368_s18 }
  0x5c   :  { %774 = vrot.lane.b32.xlu1 %v4507_v48, %s4368_s18 }
  0x5f   :  { %790 = vrot.lane.b32.xlu0 %v4500_v47, %s4368_s18 }
  0x60   :  { %808 = vrot.lane.b32.xlu1 %v4498_v46, %s4368_s18 }
  0x63   :  { %772 = vrot.lane.b32.xlu0 %v4516_v51, %s4368_s18 }
  0x64   :  { %788 = vrot.lane.b32.xlu1 %v4514_v50, %s4368_s18 }
  0x67   :  { %806 = vrot.lane.b32.xlu0 %v4511_v49, %s4368_s18 }
  0x68   :  { %770 = vrot.lane.b32.xlu1 %v4222_v54, %s4368_s18 }
  0x6b   :  { %786 = vrot.lane.b32.xlu0 %v4527_v53, %s4368_s18 }
  0x6c   :  { %804 = vrot.lane.b32.xlu1 %v4523_v52, %s4368_s18 }
  0x6f   :  { %768 = vrot.lane.b32.xlu0 %v4225_v57, %s4368_s18 }
  0x70   :  { %784 = vrot.lane.b32.xlu1 %v4224_v56, %s4368_s18 }
  0x73   :  { %802 = vrot.lane.b32.xlu0 %v4223_v55, %s4368_s18 }
  0x74   :  { %766 = vrot.lane.b32.xlu1 %v4228_v60, %s4368_s18  ;;  %v4653_v60 = vld [vmem:[#allocation2 + $0x230] sm:$0xff]  }
  0x77   :  { %782 = vrot.lane.b32.xlu0 %v4227_v59, %s4368_s18  ;;  %v4647_v59 = vld [vmem:[#allocation2 + $0x1f8] sm:$0xff]  }
  0x78   :  { %800 = vrot.lane.b32.xlu1 %v4226_v58, %s4368_s18  ;;  %v4645_v58 = vld [vmem:[#allocation2 + $0x238] sm:$0xff]  }
  0x7b   :  { %764 = vrot.lane.b32.xlu0 %v4231_v1, %s4368_s18  ;;  %v4671_v1 = vld [vmem:[#allocation2 + $0x1e8] sm:$0xff]  }
  0x7c   :  { %780 = vrot.lane.b32.xlu1 %v4230_v63, %s4368_s18  ;;  %v4663_v63 = vld [vmem:[#allocation2 + $0x278] sm:$0xff]  }
  0x7f   :  { %798 = vrot.lane.b32.xlu0 %v4229_v61, %s4368_s18  ;;  %v4655_v61 = vld [vmem:[#allocation2 + $0x1f0] sm:$0xff]  }
  0x80   :  { %796 = vrot.lane.b32.xlu1 %v4232_v3, %s4368_s18  ;;  %v4679_v3 = vld [vmem:[#allocation2 + $0x270] sm:$0xff]  }
  0x82   :  { %v715_v7 = vpop.permute.xlu0 %714 }
  0x83   :  { %v838_v8 = vsel %vm812_vm1, %v715_v7, 0  ;;  %1825 = vrot.lane.b32.xlu0 %v4647_v59, %s4368_s18  ;;  %v4685_v7 = vld [vmem:[#allocation2 + $0x220] sm:$0xff]  }
  0x84   :  { %v713_v9 = vpop.permute.xlu1 %712  ;;  %1841 = vrot.lane.b32.xlu1 %v4645_v58, %s4368_s18 }
  0x85   :  { %v835_v13 = vsel %vm812_vm1, %v713_v9, 0 }
  0x86   :  { %v731_v10 = vpop.permute.xlu0 %730 }
  0x87   :  { %4100 = vmatprep.subr.msk.bf16.mxu0 %vm812_vm1, %v731_v10  ;;  %1823 = vrot.lane.b32.xlu0 %v4655_v61, %s4368_s18 }
  0x88   :  { %3642 = vmatpush3.bf16.xpose.msra.mxu0 %v838_v8  ;;  %v729_v11 = vpop.permute.xlu1 %728  ;;  %1839 = vrot.lane.b32.xlu1 %v4653_v60, %s4368_s18  ;;  %v4687_v8 = vld [vmem:[#allocation2 + $0x1e0] sm:$0xff]  }
  0x89   :  { %4101 = vmatprep.subr.msk.bf16.mxu0 %vm812_vm1, %v729_v11 }
  0x8a   :  { %v747_v12 = vpop.permute.xlu0 %746 }
  0x8b   :  { %v886_v14 = vsel %vm812_vm1, %v747_v12, 0  ;;  %1857 = vrot.lane.b32.xlu0 %v4663_v63, %s4368_s18 }
  0x8c   :  { %v763_v15 = vpop.permute.xlu1 %762  ;;  %1873 = vrot.lane.b32.xlu1 %v4661_v62, %s4368_s18 }
  0x8d   :  { %4108 = vmatprep.subr.msk.bf16.mxu1 %vm812_vm1, %v763_v15 }
  0x8e   :  { %v711_v16 = vpop.permute.xlu0 %710  ;;  %3660 = vmatpush3.bf16.xpose.msra.mxu1 %v886_v14  ;;  %v4695_v14 = vld [vmem:[#allocation2 + $0x268] sm:$0xff]  }
  0x8f   :  { %v832_v20 = vsel %vm812_vm1, %v711_v16, 0  ;;  %1821 = vrot.lane.b32.xlu0 %v4671_v1, %s4368_s18  ;;  %v4701_v16 = vld [vmem:[#allocation2 + $0x218] sm:$0xff]  }
  0x90   :  { %3644 = vmatpush3.bf16.xpose.msra.mxu0 %v835_v13  ;;  %v727_v17 = vpop.permute.xlu1 %726  ;;  %1837 = vrot.lane.b32.xlu1 %v4669_v0, %s4368_s18  ;;  %v4693_v13 = vld [vmem:[#allocation2 + $0x2a8] sm:$0xff]  }
  0x91   :  { %4102 = vmatprep.subr.msk.bf16.mxu0 %vm812_vm1, %v727_v17  ;;  %v4703_v17 = vld [vmem:[#allocation2 + $0x1d8] sm:$0xff]  }
  0x92   :  { %v745_v18 = vpop.permute.xlu0 %744 }
  0x93   :  { %v883_v19 = vsel %vm812_vm1, %v745_v18, 0  ;;  %1855 = vrot.lane.b32.xlu0 %v4679_v3, %s4368_s18  ;;  %v4709_v18 = vld [vmem:[#allocation2 + $0x2a0] sm:$0xff]  }
  0x94   :  { %v761_v21 = vpop.permute.xlu1 %760  ;;  %1871 = vrot.lane.b32.xlu1 %v4677_v2, %s4368_s18 }
  0x95   :  { %4109 = vmatprep.subr.msk.bf16.mxu1 %vm812_vm1, %v761_v21  ;;  %v4719_v21 = vld [vmem:[#allocation2 + $0x1d0] sm:$0xff]  }
  0x96   :  { %v709_v22 = vpop.permute.xlu0 %708  ;;  %3662 = vmatpush3.bf16.xpose.msra.mxu1 %v883_v19  ;;  %v4711_v19 = vld [vmem:[#allocation2 + $0x260] sm:$0xff]  }
  0x97   :  { %v829_v26 = vsel %vm812_vm1, %v709_v22, 0  ;;  %1819 = vrot.lane.b32.xlu0 %v4687_v8, %s4368_s18  ;;  %v4725_v22 = vld [vmem:[#allocation2 + $0x298] sm:$0xff]  }
  0x98   :  { %3646 = vmatpush3.bf16.xpose.msra.mxu0 %v832_v20  ;;  %v725_v23 = vpop.permute.xlu1 %724  ;;  %1835 = vrot.lane.b32.xlu1 %v4685_v7, %s4368_s18  ;;  %v4717_v20 = vld [vmem:[#allocation2 + $0x210] sm:$0xff]  }
  0x99   :  { %4103 = vmatprep.subr.msk.bf16.mxu0 %vm812_vm1, %v725_v23  ;;  %v4727_v23 = vld [vmem:[#allocation2 + $0x258] sm:$0xff]  }
  0x9a   :  { %v743_v24 = vpop.permute.xlu0 %742 }
  0x9b   :  { %v880_v25 = vsel %vm812_vm1, %v743_v24, 0  ;;  %1853 = vrot.lane.b32.xlu0 %v4695_v14, %s4368_s18 }
  0x9c   :  { %v759_v27 = vpop.permute.xlu1 %758  ;;  %1869 = vrot.lane.b32.xlu1 %v4693_v13, %s4368_s18 }
  0x9d   :  { %4110 = vmatprep.subr.msk.bf16.mxu1 %vm812_vm1, %v759_v27 }
  0x9e   :  { %3664 = vmatpush3.bf16.xpose.msra.mxu1 %v880_v25  ;;  %v707_v28 = vpop.permute.xlu0 %706  ;;  %v3379_v25 = vld [vmem:[%s5407_s2] ss:$0 sm:$0xff] }
  0x9f   :  { %v826_v30 = vsel %vm812_vm1, %v707_v28, 0  ;;  %1817 = vrot.lane.b32.xlu0 %v4703_v17, %s4368_s18 }
  0xa0   :  { %3648 = vmatpush3.bf16.xpose.msra.mxu0 %v829_v26  ;;  %v723_v29 = vpop.permute.xlu1 %722  ;;  %1833 = vrot.lane.b32.xlu1 %v4701_v16, %s4368_s18 }
  0xa1   :  { %4104 = vmatprep.subr.msk.bf16.mxu0 %vm812_vm1, %v723_v29 }
  0xa3   :  { %1851 = vrot.lane.b32.xlu0 %v4711_v19, %s4368_s18 }
  0xa4   :  { %1867 = vrot.lane.b32.xlu1 %v4709_v18, %s4368_s18 }
  0xa5   :  { %v741_v31 = vpop.permute.xlu0 %740  ;;  %v757_v33 = vpop.permute.xlu1 %756 }
  0xa6   :  { %v877_v32 = vsel %vm812_vm1, %v741_v31, 0  ;;  %4111 = vmatprep.subr.msk.bf16.mxu1 %vm812_vm1, %v757_v33 }
  0xa7   :  { %3666 = vmatpush3.bf16.xpose.msra.mxu1 %v877_v32  ;;  %1815 = vrot.lane.b32.xlu0 %v4719_v21, %s4368_s18 }
  0xa8   :  { %3650 = vmatpush3.bf16.xpose.msra.mxu0 %v826_v30  ;;  %1831 = vrot.lane.b32.xlu1 %v4717_v20, %s4368_s18 }
  0xa9   :  { %v705_v34 = vpop.permute.xlu0 %704  ;;  %v721_v35 = vpop.permute.xlu1 %720 }
  0xaa   :  { %v823_v36 = vsel %vm812_vm1, %v705_v34, 0  ;;  %4105 = vmatprep.subr.msk.bf16.mxu0 %vm812_vm1, %v721_v35 }
  0xab   :  { %1849 = vrot.lane.b32.xlu0 %v4727_v23, %s4368_s18 }
  0xac   :  { %1865 = vrot.lane.b32.xlu1 %v4725_v22, %s4368_s18 }
  0xad   :  { %v739_v37 = vpop.permute.xlu0 %738  ;;  %v755_v40 = vpop.permute.xlu1 %754 }
  0xae   :  { %v874_v38 = vsel %vm812_vm1, %v739_v37, 0  ;;  %4112 = vmatprep.subr.msk.bf16.mxu1 %vm812_vm1, %v755_v40 }
  0xaf   :  { %3668 = vmatpush3.bf16.xpose.msra.mxu1 %v874_v38 }
  0xb0   :  { %3652 = vmatpush3.bf16.xpose.msra.mxu0 %v823_v36 }
  0xb1   :  { %v703_v41 = vpop.permute.xlu0 %702  ;;  %v719_v42 = vpop.permute.xlu1 %718 }
  0xb2   :  { %v820_v43 = vsel %vm812_vm1, %v703_v41, 0  ;;  %4106 = vmatprep.subr.msk.bf16.mxu0 %vm812_vm1, %v719_v42 }
  0xb5   :  { %v737_v44 = vpop.permute.xlu0 %736  ;;  %v753_v46 = vpop.permute.xlu1 %752 }
  0xb6   :  { %v871_v45 = vsel %vm812_vm1, %v737_v44, 0  ;;  %4113 = vmatprep.subr.msk.bf16.mxu1 %vm812_vm1, %v753_v46 }
  0xb7   :  { %3670 = vmatpush3.bf16.xpose.msra.mxu1 %v871_v45 }
  0xb8   :  { %3654 = vmatpush3.bf16.xpose.msra.mxu0 %v820_v43 }
  0xb9   :  { %v701_v47 = vpop.permute.xlu0 %700  ;;  %v717_v48 = vpop.permute.xlu1 %716 }
  0xba   :  { %v817_v49 = vsel %vm812_vm1, %v701_v47, 0  ;;  %4107 = vmatprep.subr.msk.bf16.mxu0 %vm812_vm1, %v717_v48 }
  0xbd   :  { %v735_v50 = vpop.permute.xlu0 %734  ;;  %v751_v52 = vpop.permute.xlu1 %750 }
  0xbe   :  { %v868_v51 = vsel %vm812_vm1, %v735_v50, 0  ;;  %4114 = vmatprep.subr.msk.bf16.mxu1 %vm812_vm1, %v751_v52 }
  0xbf   :  { %3672 = vmatpush3.bf16.xpose.msra.mxu1 %v868_v51 }
  0xc0   :  { %3656 = vmatpush3.bf16.xpose.msra.mxu0 %v817_v49 }
  0xc1   :  { %v4639_v53 = vpop.permute.xlu0 %778 }
  0xc2   :  { %v795_v54 = vpop.permute.xlu1 %794  ;;  %v934_v49 = vsel %vm812_vm1, %v4639_v53, 0 }
  0xc3   :  { %4116 = vmatprep.subr.msk.bf16.mxu0 %vm812_vm1, %v795_v54 }
  0xc5   :  { %v733_v55 = vpop.permute.xlu0 %732 }
  0xc6   :  { %v865_v56 = vsel %vm812_vm1, %v733_v55, 0  ;;  %v749_v57 = vpop.permute.xlu1 %748 }
  0xc7   :  { %4115 = vmatprep.subr.msk.bf16.mxu1 %vm812_vm1, %v749_v57 }
  0xc8   :  { %3674 = vmatpush3.bf16.xpose.msra.mxu1 %v865_v56 }
  0xc9   :  { %4000 = vmatprep.subr.bf16.mxu1 %v4370_v39  ;;  %v777_v34 = vpop.permute.xlu0 %776 }
  0xca   :  { %v793_v38 = vpop.permute.xlu1 %792  ;;  %v931_v54 = vsel %vm812_vm1, %v777_v34, 0 }
  0xcd   :  { %v811_v44 = vpop.permute.xlu0 %810 }
  0xce   :  { %v775_v46 = vpop.permute.xlu1 %774  ;;  %v982_v47 = vsel %vm812_vm1, %v811_v44, 0  ;;  %v4879_v44 = vld [vmem:[#allocation2 + $0x358] sm:$0xff]  }
  0xd1   :  { %v791_v48 = vpop.permute.xlu0 %790 }
  0xd2   :  { %v809_v50 = vpop.permute.xlu1 %808 }
  0xd3   :  { %v979_v52 = vsel %vm812_vm1, %v809_v50, 0  ;;  %v4896_v50 = vld [vmem:[#allocation2 + $0x300] sm:$0xff]  }
  0xd5   :  { %v773_v51 = vpop.permute.xlu0 %772 }
  0xd6   :  { %v789_v53 = vpop.permute.xlu1 %788 }
  0xd9   :  { %v807_v55 = vpop.permute.xlu0 %806 }
  0xda   :  { %v771_v56 = vpop.permute.xlu1 %770  ;;  %v976_v57 = vsel %vm812_vm1, %v807_v55, 0 }
  0xef   :  { %v3582_v4 = vpop.f32.mrf.mxu0 }
  0xf0   :  { %v3604_v5 = vpop.f32.mrf.mxu1 }
  0xf1   :  { %v3583_v6 = vpop.f32.mrf.mxu0 }
  0xf2   :  { %v3605_v9 = vpop.f32.mrf.mxu1  ;;  %v3584_v24 = vadd.f32 %v3583_v6, %v3582_v4  ;;  %v787_v4 = vpop.permute.xlu0 %786 }
  0xf3   :  { %v3585_v10 = vpop.f32.mrf.mxu0  ;;  %v3606_v27 = vadd.f32 %v3605_v9, %v3604_v5  ;;  %v928_v5 = vsel %vm812_vm1, %v775_v46, 0  ;;  %v805_v6 = vpop.permute.xlu1 %804  ;;  %v4885_v46 = vld [vmem:[#allocation2 + $0x2c8] sm:$0xff]  }
  0xf4   :  { %v3607_v11 = vpop.f32.mrf.mxu1  ;;  %v536_v26 = vadd.f32 %v3584_v24, %v3379_v25  ;;  %v973_v10 = vsel %vm812_vm1, %v805_v6, 0 }
  0xf5   :  { %v3586_v12 = vpop.f32.mrf.mxu0 }
  0xf6   :  { %v3608_v15 = vpop.f32.mrf.mxu1  ;;  %v576_v31 = vadd.f32 %v3606_v27, %v536_v26  ;;  %v769_v9 = vpop.permute.xlu0 %768  ;;  %v925_v12 = vsel %vm812_vm1, %v773_v51, 0  ;;  %v922_v27 = vsel %vm812_vm1, %v771_v56, 0  ;;  %v4286_v51 = vld [vmem:[#allocation2 + $0x340] sm:$0xff]  }
  0xf7   :  { %v785_v11 = vpop.permute.xlu1 %784  ;;  %v4909_v56 = vld [vmem:[%s5408_s3] sm:$0xff] }
  0xfa   :  { %v803_v15 = vpop.permute.xlu0 %802 }
  0xfb   :  { %v767_v24 = vpop.permute.xlu1 %766  ;;  %v970_v25 = vsel %vm812_vm1, %v803_v15, 0 }
  0xfe   :  { %v783_v26 = vpop.permute.xlu0 %782 }
 0x10f   :  { %v3626_v28 = vpop.f32.mrf.mxu0 }
 0x110   :  { %v655_v29 = vpop.f32.mrf.mxu1 }
 0x111   :  { %v3627_v30 = vpop.f32.mrf.mxu0 }
 0x112   :  { %v3628_v32 = vadd.f32 %v3627_v30, %v3626_v28  ;;  %v3998_v33 = vpop.f32.mrf.mxu1  ;;  %v801_v28 = vpop.permute.xlu1 %800 }
 0x113   :  { %v3629_v35 = vpop.f32.mrf.mxu0  ;;  %v967_v30 = vsel %vm812_vm1, %v801_v28, 0 }
 0x114   :  { %v616_v36 = vadd.f32 %v3628_v32, %v576_v31  ;;  %v658_v37 = vpop.f32.mrf.mxu1  ;;  %v919_v31 = vsel %vm812_vm1, %v769_v9, 0  ;;  %v916_v35 = vsel %vm812_vm1, %v767_v24, 0 }
 0x115   :  { %v3630_v40 = vpop.f32.mrf.mxu0 }
 0x116   :  { %v656_v41 = vadd.f32 %v655_v29, %v616_v36  ;;  %v3999_v42 = vpop.f32.mrf.mxu1  ;;  %v765_v29 = vpop.permute.xlu0 %764  ;;  %v4257_v40 = vld [vmem:[#allocation2 + $0x208] sm:$0xff]  }
 0x117   :  { %v781_v33 = vpop.permute.xlu1 %780  ;;  %1829 = vrot.lane.b32.xlu1 %v4257_v40, %s4368_s18  ;;  %v4871_v42 = vld [vmem:[#allocation2 + $0x310] sm:$0xff]  }
 0x118   :  { %v661_v43 = vmax.f32 %v656_v41, 0.0  ;;  %v4259_v41 = vld [vmem:[#allocation2 + $0x1c8] sm:$0xff]  }
 0x119   :  { %1813 = vrot.lane.b32.xlu0 %v4259_v41, %s4368_s18 }
 0x11a   :  { %v4736_v45 = vpack.c.bf16 %v661_v43, %v661_v43  ;;  %v799_v32 = vpop.permute.xlu0 %798  ;;  %v4873_v43 = vld [vmem:[#allocation2 + $0x2d0] sm:$0xff]  }
 0x11b   :  { %v964_v34 = vsel %vm812_vm1, %v799_v32, 0  ;;  %v797_v36 = vpop.permute.xlu1 %796 }
 0x11c   :  { %3657 = vmatprep.mubr.msk.bf16.mxu0 %vm812_vm1, %v4736_v45  ;;  %3675 = vmatprep.mubr.msk.bf16.mxu1 %vm812_vm1, %v4736_v45  ;;  %v961_v37 = vsel %vm812_vm1, %v797_v36, 0 }
 0x11d   :  { %3658 = vmatmul.mubr.msk.bf16.vlgmr.msra.gmra.mxu0 %vm812_vm1, %v4736_v45  ;;  %3676 = vmatmul.mubr.msk.bf16.vlgmr.msra.gmra.mxu1 %vm812_vm1, %v4736_v45 }
 0x11e   :  { %3678 = vmatpush3.bf16.xpose.msra.mxu0 %v934_v49  ;;  %4001 = vmatpush3.bf16.xpose.msra.mxu1 %v982_v47  ;;  %v4280_v47 = vld [vmem:[#allocation2 + $0x350] sm:$0xff]   ;;  %v4283_v49 = vld [vmem:[#allocation2 + $0x348] sm:$0xff]  }
 0x11f   :  { %3693 = vmatprep.mubr.msk.bf16.mxu0 %vm812_vm1, %v4736_v45  ;;  %4117 = vmatprep.subr.msk.bf16.mxu0 %vm812_vm1, %v793_v38  ;;  %v913_v38 = vsel %vm812_vm1, %v765_v29, 0 }
 0x120   :  { %4002 = vmatprep.subr.bf16.mxu1 %v4370_v39  ;;  %4016 = vmatprep.mubr.msk.bf16.mxu1 %vm4371_vm0, %v4370_v39 }
 0x126   :  { %3680 = vmatpush3.bf16.xpose.msra.mxu0 %v931_v54  ;;  %4003 = vmatpush3.bf16.xpose.msra.mxu1 %v979_v52  ;;  %v665_v52 = vlaneseq }
 0x127   :  { %4118 = vmatprep.subr.msk.bf16.mxu0 %vm812_vm1, %v791_v48  ;;  %4004 = vmatprep.subr.bf16.mxu1 %v4370_v39  ;;  %v4891_v48 = vld [vmem:[#allocation2 + $0x2c0] sm:$0xff]  }
 0x12e   :  { %3682 = vmatpush3.bf16.xpose.msra.mxu0 %v928_v5  ;;  %4005 = vmatpush3.bf16.xpose.msra.mxu1 %v976_v57 }
 0x12f   :  { %4119 = vmatprep.subr.msk.bf16.mxu0 %vm812_vm1, %v789_v53  ;;  %4006 = vmatprep.subr.bf16.mxu1 %v4370_v39  ;;  %v666_v53 = vshrl.u32 %v665_v52, 7 }
 0x131   :  { %v4902_v54 = vsub.s32 0, %v666_v53  ;;  %v4904_v55 = vsub.s32 2, %v666_v53  ;;  %v4911_v57 = vsub.s32 1, %v666_v53 }
 0x133   :  { %v668_v5 = vrot.slane %v4909_v56, %v4902_v54  ;;  %v676_v6 = vrot.slane %v4909_v56, %v4904_v55  ;;  %v672_v9 = vrot.slane %v4909_v56, %v4911_v57 }
 0x136   :  { %3684 = vmatpush3.bf16.xpose.msra.mxu0 %v925_v12  ;;  %4007 = vmatpush3.bf16.xpose.msra.mxu1 %v973_v10 }
 0x137   :  { %4120 = vmatprep.subr.msk.bf16.mxu0 %vm812_vm1, %v787_v4  ;;  %4008 = vmatprep.subr.bf16.mxu1 %v4370_v39  ;;  %v4913_v4 = vsub.s32 3, %v666_v53 }
 0x139   :  { %v680_v10 = vrot.slane %v4909_v56, %v4913_v4 }
 0x13e   :  { %3686 = vmatpush3.bf16.xpose.msra.mxu0 %v922_v27  ;;  %4009 = vmatpush3.bf16.xpose.msra.mxu1 %v970_v25 }
 0x13f   :  { %4121 = vmatprep.subr.msk.bf16.mxu0 %vm812_vm1, %v785_v11  ;;  %4010 = vmatprep.subr.bf16.mxu1 %v4370_v39 }
 0x146   :  { %3688 = vmatpush3.bf16.xpose.msra.mxu0 %v919_v31  ;;  %4011 = vmatpush3.bf16.xpose.msra.mxu1 %v967_v30 }
 0x147   :  { %4122 = vmatprep.subr.msk.bf16.mxu0 %vm812_vm1, %v783_v26  ;;  %4012 = vmatprep.subr.bf16.mxu1 %v4370_v39 }
 0x14e   :  { %3690 = vmatpush3.bf16.xpose.msra.mxu0 %v916_v35  ;;  %4013 = vmatpush3.bf16.xpose.msra.mxu1 %v964_v34 }
 0x14f   :  { %4123 = vmatprep.subr.msk.bf16.mxu0 %vm812_vm1, %v781_v33  ;;  %4014 = vmatprep.subr.bf16.mxu1 %v4370_v39 }
 0x156   :  { %3692 = vmatpush3.bf16.xpose.msra.mxu0 %v913_v38  ;;  %4015 = vmatpush3.bf16.xpose.msra.mxu1 %v961_v37  ;;  %v4952_v37 = vsub.s32 6, %v666_v53  ;;  %v4954_v38 = vsub.s32 4, %v666_v53 }
 0x157   :  { %3704 = vmatprep.subr.bf16.mxu0 %v4645_v58  ;;  %3726 = vmatprep.subr.bf16.mxu1 %v4661_v62  ;;  %v4254_v58 = vld [vmem:[#allocation2 + $0x290] sm:$0xff]  }
 0x158   :  { %v4256_v62 = vld [vmem:[#allocation2 + $0x250] sm:$0xff]   ;;  %1863 = vrot.lane.b32.xlu1 %v4254_v58, %s4368_s18 }
 0x159   :  { %1847 = vrot.lane.b32.xlu0 %v4256_v62, %s4368_s18 }
 0x15d   :  { %3694 = vmatmul.mubr.msk.bf16.vlgmr.msra.gmra.mxu0 %vm812_vm1, %v4736_v45  ;;  %4017 = vmatmul.mubr.msk.bf16.vlgmr.msra.gmra.mxu1 %vm812_vm1, %v4736_v45  ;;  %v4883_v45 = vld [vmem:[#allocation2 + $0x308] sm:$0xff]  }
 0x15e   :  { %3705 = vmatpush3.bf16.msra.mxu0 %v4647_v59  ;;  %3727 = vmatpush3.bf16.msra.mxu1 %v4663_v63  ;;  %v4261_v59 = vld [vmem:[#allocation2 + $0x200] sm:$0xff]   ;;  %v4260_v63 = vld [vmem:[#allocation2 + $0x248] sm:$0xff]  }
 0x15f   :  { %3706 = vmatprep.subr.bf16.mxu0 %v4653_v60  ;;  %3728 = vmatprep.subr.bf16.mxu1 %v4677_v2  ;;  %v4263_v60 = vld [vmem:[#allocation2 + $0x1c0] sm:$0xff]  }
 0x160   :  { %1827 = vrot.lane.b32.xlu1 %v4261_v59, %s4368_s18  ;;  %1811 = vrot.lane.b32.xlu0 %v4263_v60, %s4368_s18  ;;  %v4262_v2 = vld [vmem:[#allocation2 + $0x280] sm:$0xff]  }
 0x162   :  { %3707 = vmatpush3.bf16.msra.mxu0 %v4655_v61  ;;  %3729 = vmatpush3.bf16.msra.mxu1 %v4679_v3  ;;  %v4258_v61 = vld [vmem:[#allocation2 + $0x288] sm:$0xff]   ;;  %v4264_v3 = vld [vmem:[#allocation2 + $0x240] sm:$0xff]  }
 0x163   :  { %3708 = vmatprep.subr.bf16.mxu0 %v4669_v0  ;;  %3730 = vmatprep.subr.bf16.mxu1 %v4693_v13  ;;  %v4266_v0 = vld [vmem:[#allocation2 + $0x338] sm:$0xff]  }
 0x164   :  { %1861 = vrot.lane.b32.xlu1 %v4258_v61, %s4368_s18  ;;  %1845 = vrot.lane.b32.xlu0 %v4260_v63, %s4368_s18  ;;  %v4830_v13 = vld [vmem:[#allocation2 + $0x378] sm:$0xff]  }
 0x166   :  { %3709 = vmatpush3.bf16.msra.mxu0 %v4671_v1  ;;  %3731 = vmatpush3.bf16.msra.mxu1 %v4695_v14  ;;  %v4813_v1 = vld [vmem:[#allocation2 + $0x2f8] sm:$0xff]   ;;  %v4832_v14 = vld [vmem:[#allocation2 + $0x2e8] sm:$0xff]  }
 0x167   :  { %3710 = vmatprep.subr.bf16.mxu0 %v4685_v7  ;;  %3732 = vmatprep.subr.bf16.mxu1 %v4709_v18  ;;  %v4822_v7 = vld [vmem:[#allocation2 + $0x330] sm:$0xff]   ;;  %v4847_v18 = vld [vmem:[#allocation2 + $0x320] sm:$0xff]  }
 0x168   :  { %1905 = vrot.lane.b32.xlu1 %v4266_v0, %s4368_s18  ;;  %1889 = vrot.lane.b32.xlu0 %v4813_v1, %s4368_s18 }
 0x16a   :  { %3711 = vmatpush3.bf16.msra.mxu0 %v4687_v8  ;;  %3733 = vmatpush3.bf16.msra.mxu1 %v4711_v19  ;;  %v4824_v8 = vld [vmem:[#allocation2 + $0x2f0] sm:$0xff]   ;;  %v4849_v19 = vld [vmem:[#allocation2 + $0x2e0] sm:$0xff]  }
 0x16b   :  { %3712 = vmatprep.subr.bf16.mxu0 %v4701_v16  ;;  %3734 = vmatprep.subr.bf16.mxu1 %v4725_v22  ;;  %v4839_v16 = vld [vmem:[#allocation2 + $0x370] sm:$0xff]   ;;  %v4863_v22 = vld [vmem:[#allocation2 + $0x360] sm:$0xff]  }
 0x16c   :  { %1859 = vrot.lane.b32.xlu1 %v4262_v2, %s4368_s18  ;;  %1843 = vrot.lane.b32.xlu0 %v4264_v3, %s4368_s18 }
 0x16e   :  { %3713 = vmatpush3.bf16.msra.mxu0 %v4703_v17  ;;  %3735 = vmatpush3.bf16.msra.mxu1 %v4727_v23  ;;  %v4841_v17 = vld [vmem:[#allocation2 + $0x328] sm:$0xff]   ;;  %v4865_v23 = vld [vmem:[#allocation2 + $0x318] sm:$0xff]  }
 0x16f   :  { %3714 = vmatprep.subr.bf16.mxu0 %v4717_v20  ;;  %3736 = vmatprep.subr.bf16.mxu1 %v4254_v58  ;;  %v4855_v20 = vld [vmem:[#allocation2 + $0x368] sm:$0xff]   ;;  %v684_v58 = vrot.slane %v4909_v56, %v4954_v38 }
 0x170   :  { %1887 = vrot.lane.b32.xlu0 %v4824_v8, %s4368_s18  ;;  %1903 = vrot.lane.b32.xlu1 %v4822_v7, %s4368_s18 }
 0x172   :  { %3715 = vmatpush3.bf16.msra.mxu0 %v4719_v21  ;;  %3737 = vmatpush3.bf16.msra.mxu1 %v4256_v62  ;;  %v4857_v21 = vld [vmem:[#allocation2 + $0x2d8] sm:$0xff]  }
 0x173   :  { %3716 = vmatprep.subr.bf16.mxu0 %v4257_v40  ;;  %3738 = vmatprep.subr.bf16.mxu1 %v4258_v61  ;;  %v4956_v40 = vsub.s32 5, %v666_v53 }
 0x174   :  { %1921 = vrot.lane.b32.xlu0 %v4830_v13, %s4368_s18  ;;  %1885 = vrot.lane.b32.xlu1 %v4832_v14, %s4368_s18 }
 0x175   :  { %v688_v62 = vrot.slane %v4909_v56, %v4956_v40 }
 0x176   :  { %3717 = vmatpush3.bf16.msra.mxu0 %v4259_v41  ;;  %3739 = vmatpush3.bf16.msra.mxu1 %v4260_v63  ;;  %v692_v41 = vrot.slane %v4909_v56, %v4952_v37 }
 0x177   :  { %3718 = vmatprep.subr.bf16.mxu0 %v4261_v59  ;;  %3740 = vmatprep.subr.bf16.mxu1 %v4262_v2 }
 0x178   :  { %1919 = vrot.lane.b32.xlu1 %v4839_v16, %s4368_s18  ;;  %1901 = vrot.lane.b32.xlu0 %v4841_v17, %s4368_s18 }
 0x17a   :  { %3719 = vmatpush3.bf16.msra.mxu0 %v4263_v60  ;;  %3741 = vmatpush3.bf16.msra.mxu1 %v4264_v3 }
 0x17b   :  { %4020 = vmatprep.subr.bf16.mxu1 %v4370_v39  ;;  %3748 = vmatprep.subr.bf16.mxu0 %v4266_v0 }
 0x17c   :  { %1883 = vrot.lane.b32.xlu0 %v4849_v19, %s4368_s18  ;;  %1899 = vrot.lane.b32.xlu1 %v4847_v18, %s4368_s18 }
 0x180   :  { %1917 = vrot.lane.b32.xlu0 %v4855_v20, %s4368_s18  ;;  %1881 = vrot.lane.b32.xlu1 %v4857_v21, %s4368_s18 }
 0x184   :  { %1915 = vrot.lane.b32.xlu1 %v4863_v22, %s4368_s18  ;;  %1897 = vrot.lane.b32.xlu0 %v4865_v23, %s4368_s18 }
 0x188   :  { %1879 = vrot.lane.b32.xlu0 %v4873_v43, %s4368_s18  ;;  %1895 = vrot.lane.b32.xlu1 %v4871_v42, %s4368_s18 }
 0x18c   :  { %1913 = vrot.lane.b32.xlu0 %v4879_v44, %s4368_s18  ;;  %1877 = vrot.lane.b32.xlu1 %v4885_v46, %s4368_s18 }
 0x190   :  { %1893 = vrot.lane.b32.xlu0 %v4883_v45, %s4368_s18  ;;  %1911 = vrot.lane.b32.xlu1 %v4280_v47, %s4368_s18 }
 0x194   :  { %1875 = vrot.lane.b32.xlu0 %v4891_v48, %s4368_s18  ;;  %1891 = vrot.lane.b32.xlu1 %v4896_v50, %s4368_s18 }
 0x198   :  { %1909 = vrot.lane.b32.xlu0 %v4283_v49, %s4368_s18  ;;  %1907 = vrot.lane.b32.xlu1 %v4286_v51, %s4368_s18 }
 0x1dd   :  { %v1018_v11 = vpop.f32.mrf.mxu0  ;;  %v1059_v12 = vpop.f32.mrf.mxu1 }
 0x1de   :  { %v1019_v15 = vadd.f32 %v1018_v11, %v668_v5  ;;  %v1060_v24 = vadd.f32 %v1059_v12, %v676_v6 }
 0x1df   :  { %v1020_v25 = vpop.f32.mrf.mxu0  ;;  %v1061_v26 = vpop.f32.mrf.mxu1 }
 0x1e0   :  { %v1021_v27 = vadd.f32 %v1020_v25, %v672_v9  ;;  %v1062_v28 = vadd.f32 %v1061_v26, %v680_v10  ;;  %v1260_v33 = vpack.c.bf16 %v1019_v15, %v1019_v15  ;;  %v1262_v34 = vpack.c.bf16 %v1060_v24, %v1060_v24 }
 0x1e1   :  { %v1022_v29 = vpop.f32.mrf.mxu0  ;;  %v1063_v30 = vpop.f32.mrf.mxu1 }
 0x1e2   :  { %v1261_v31 = vpack.c.bf16 %v1021_v27, %v1021_v27  ;;  %v1263_v32 = vpack.c.bf16 %v1062_v28, %v1062_v28 }
 0x1e3   :  { %v1023_v35 = vpop.f32.mrf.mxu0  ;;  %v1064_v36 = vpop.f32.mrf.mxu1 }
 0x1e4   :  { %1643 = vmatprep.mubr.bf16.mxu0 %v1261_v31  ;;  %1683 = vmatprep.mubr.bf16.mxu1 %v1263_v32 }
 0x1e5   :  { %1644 = vmatmul.mubr.bf16.vlgmr.msra.gmra.mxu0 %v1260_v33  ;;  %1684 = vmatmul.mubr.bf16.vlgmr.msra.gmra.mxu1 %v1262_v34 }
 0x1e6   :  { %4021 = vmatpush3.bf16.msra.mxu1 %v4830_v13  ;;  %3749 = vmatpush3.bf16.msra.mxu0 %v4813_v1 }
 0x1e7   :  { %4022 = vmatprep.subr.bf16.mxu1 %v4370_v39  ;;  %3750 = vmatprep.subr.bf16.mxu0 %v4822_v7 }
 0x1e8   :  { %4036 = vmatprep.mubr.msk.bf16.mxu1 %vm4371_vm0, %v4370_v39 }
 0x1ea   :  { %4023 = vmatpush3.bf16.msra.mxu1 %v4839_v16  ;;  %3751 = vmatpush3.bf16.msra.mxu0 %v4824_v8 }
 0x1eb   :  { %4024 = vmatprep.subr.bf16.mxu1 %v4370_v39  ;;  %3752 = vmatprep.subr.bf16.mxu0 %v4841_v17 }
 0x1ee   :  { %4025 = vmatpush3.bf16.msra.mxu1 %v4855_v20  ;;  %3753 = vmatpush3.bf16.msra.mxu0 %v4832_v14 }
 0x1ef   :  { %4026 = vmatprep.subr.bf16.mxu1 %v4370_v39  ;;  %3754 = vmatprep.subr.bf16.mxu0 %v4847_v18  ;;  %v1842_v18 = vpop.permute.xlu1 %1841 }
 0x1f2   :  { %4027 = vmatpush3.bf16.msra.mxu1 %v4863_v22  ;;  %3755 = vmatpush3.bf16.msra.mxu0 %v4849_v19  ;;  %v1826_v19 = vpop.permute.xlu0 %1825 }
 0x1f3   :  { %4028 = vmatprep.subr.bf16.mxu1 %v4370_v39  ;;  %3756 = vmatprep.subr.bf16.mxu0 %v4865_v23  ;;  %v1948_v20 = vsel %vm812_vm1, %v1826_v19, 0 }
 0x1f6   :  { %4029 = vmatpush3.bf16.msra.mxu1 %v4879_v44  ;;  %3757 = vmatpush3.bf16.msra.mxu0 %v4857_v21  ;;  %v1840_v21 = vpop.permute.xlu1 %1839  ;;  %v1824_v22 = vpop.permute.xlu0 %1823 }
 0x1f7   :  { %4030 = vmatprep.subr.bf16.mxu1 %v4370_v39  ;;  %3758 = vmatprep.subr.bf16.mxu0 %v4871_v42 }
 0x1fa   :  { %4031 = vmatpush3.bf16.msra.mxu1 %v4280_v47  ;;  %3759 = vmatpush3.bf16.msra.mxu0 %v4873_v43  ;;  %v1874_v23 = vpop.permute.xlu1 %1873  ;;  %v1858_v42 = vpop.permute.xlu0 %1857  ;;  %v1945_v43 = vsel %vm812_vm1, %v1824_v22, 0  ;;  %v5008_v22 = vld [vmem:[#allocation2 + $0x478] sm:$0xff]  }
 0x1fb   :  { %4032 = vmatprep.subr.bf16.mxu1 %v4370_v39  ;;  %3760 = vmatprep.subr.bf16.mxu0 %v4883_v45  ;;  %v1996_v44 = vsel %vm812_vm1, %v1858_v42, 0  ;;  %v5016_v42 = vld [vmem:[#allocation2 + $0x3f0] sm:$0xff]  }
 0x1fe   :  { %4033 = vmatpush3.bf16.msra.mxu1 %v4283_v49  ;;  %3761 = vmatpush3.bf16.msra.mxu0 %v4885_v46  ;;  %v1838_v45 = vpop.permute.xlu1 %1837  ;;  %v1822_v46 = vpop.permute.xlu0 %1821 }
 0x1ff   :  { %4034 = vmatprep.subr.bf16.mxu1 %v4370_v39  ;;  %3762 = vmatprep.subr.bf16.mxu0 %v4896_v50  ;;  %v1942_v49 = vsel %vm812_vm1, %v1822_v46, 0  ;;  %v5032_v46 = vld [vmem:[#allocation2 + $0x3e8] sm:$0xff]  }
 0x202   :  { %4035 = vmatpush3.bf16.msra.mxu1 %v4286_v51  ;;  %3763 = vmatpush3.bf16.msra.mxu0 %v4891_v48  ;;  %v1872_v47 = vpop.permute.xlu1 %1871  ;;  %v1856_v48 = vpop.permute.xlu0 %1855 }
 0x203   :  { %4124 = vmatprep.subr.msk.bf16.mxu0 %vm812_vm1, %v1842_v18  ;;  %4132 = vmatprep.subr.msk.bf16.mxu1 %vm812_vm1, %v1874_v23  ;;  %v1993_v50 = vsel %vm812_vm1, %v1856_v48, 0  ;;  %v5010_v23 = vld [vmem:[#allocation2 + $0x438] sm:$0xff]   ;;  %v5040_v48 = vld [vmem:[#allocation2 + $0x468] sm:$0xff]  }
 0x206   :  { %v1836_v51 = vpop.permute.xlu1 %1835  ;;  %v1820_v52 = vpop.permute.xlu0 %1819 }
 0x207   :  { %v1939_v5 = vsel %vm812_vm1, %v1820_v52, 0  ;;  %v5056_v52 = vld [vmem:[#allocation2 + $0x460] sm:$0xff]  }
 0x20a   :  { %v1870_v53 = vpop.permute.xlu1 %1869  ;;  %v1854_v56 = vpop.permute.xlu0 %1853 }
 0x20b   :  { %v1990_v6 = vsel %vm812_vm1, %v1854_v56, 0  ;;  %v5064_v56 = vld [vmem:[#allocation2 + $0x3d8] sm:$0xff]  }
 0x20e   :  { %v1834_v9 = vpop.permute.xlu1 %1833  ;;  %v1818_v10 = vpop.permute.xlu0 %1817 }
 0x20f   :  { %v1936_v15 = vsel %vm812_vm1, %v1818_v10, 0  ;;  %v5080_v10 = vld [vmem:[#allocation2 + $0x3d0] sm:$0xff]  }
 0x212   :  { %v1868_v11 = vpop.permute.xlu1 %1867  ;;  %v1852_v12 = vpop.permute.xlu0 %1851 }
 0x213   :  { %v1987_v24 = vsel %vm812_vm1, %v1852_v12, 0  ;;  %v5088_v12 = vld [vmem:[#allocation2 + $0x450] sm:$0xff]  }
 0x216   :  { %v1832_v25 = vpop.permute.xlu1 %1831  ;;  %v1816_v26 = vpop.permute.xlu0 %1815 }
 0x217   :  { %v1933_v29 = vsel %vm812_vm1, %v1816_v26, 0 }
 0x21a   :  { %v1866_v27 = vpop.permute.xlu1 %1865  ;;  %v1850_v28 = vpop.permute.xlu0 %1849 }
 0x21b   :  { %v1984_v30 = vsel %vm812_vm1, %v1850_v28, 0 }
 0x21d   :  { %v1100_v59 = vpop.f32.mrf.mxu0  ;;  %v1141_v60 = vpop.f32.mrf.mxu1 }
 0x21e   :  { %v1142_v61 = vadd.f32 %v1141_v60, %v692_v41  ;;  %v1101_v63 = vadd.f32 %v1100_v59, %v684_v58  ;;  %v1830_v31 = vpop.permute.xlu1 %1829  ;;  %v1814_v32 = vpop.permute.xlu0 %1813 }
 0x21f   :  { %v1102_v0 = vpop.f32.mrf.mxu0  ;;  %v4018_v1 = vpop.f32.mrf.mxu1  ;;  %v1930_v35 = vsel %vm812_vm1, %v1814_v32, 0 }
 0x220   :  { %v1266_v2 = vpack.c.bf16 %v1142_v61, %v1142_v61  ;;  %v1103_v3 = vadd.f32 %v1102_v0, %v688_v62  ;;  %v1264_v14 = vpack.c.bf16 %v1101_v63, %v1101_v63 }
 0x221   :  { %v1104_v7 = vpop.f32.mrf.mxu0  ;;  %v1144_v8 = vpop.f32.mrf.mxu1 }
 0x222   :  { %v1265_v13 = vpack.c.bf16 %v1103_v3, %v1103_v3  ;;  %4037 = vmatmul.mubr.bf16.vlgmr.msra.gmra.mxu1 %v1266_v2  ;;  %v1864_v33 = vpop.permute.xlu1 %1863  ;;  %v1848_v34 = vpop.permute.xlu0 %1847 }
 0x223   :  { %v1105_v16 = vpop.f32.mrf.mxu0  ;;  %v4019_v17 = vpop.f32.mrf.mxu1  ;;  %3798 = vmatpush3.bf16.xpose.msra.mxu1 %v1996_v44  ;;  %v1981_v36 = vsel %vm812_vm1, %v1848_v34, 0  ;;  %v5024_v44 = vld [vmem:[#allocation2 + $0x470] sm:$0xff]  }
 0x224   :  { %1723 = vmatprep.mubr.bf16.mxu0 %v1265_v13  ;;  %4133 = vmatprep.subr.msk.bf16.mxu1 %vm812_vm1, %v1872_v47  ;;  %v5034_v47 = vld [vmem:[#allocation2 + $0x3a8] sm:$0xff]  }
 0x225   :  { %1724 = vmatmul.mubr.bf16.vlgmr.msra.gmra.mxu0 %v1264_v14 }
 0x226   :  { %3780 = vmatpush3.bf16.xpose.msra.mxu0 %v1948_v20  ;;  %v1828_v41 = vpop.permute.xlu1 %1827  ;;  %v1812_v58 = vpop.permute.xlu0 %1811  ;;  %v5000_v20 = vld [vmem:[#allocation2 + $0x3f8] sm:$0xff]  }
 0x227   :  { %4125 = vmatprep.subr.msk.bf16.mxu0 %vm812_vm1, %v1840_v21  ;;  %v1927_v60 = vsel %vm812_vm1, %v1812_v58, 0  ;;  %v5002_v21 = vld [vmem:[#allocation2 + $0x3b8] sm:$0xff]   ;;  %2951 = vrot.lane.b32.xlu1 %v5000_v20, %s4368_s18 }
 0x228   :  { %2935 = vrot.lane.b32.xlu0 %v5002_v21, %s4368_s18 }
 0x22a   :  { %v1862_v62 = vpop.permute.xlu1 %1861  ;;  %v1846_v59 = vpop.permute.xlu0 %1845 }
 0x22b   :  { %3800 = vmatpush3.bf16.xpose.msra.mxu1 %v1993_v50  ;;  %v1978_v61 = vsel %vm812_vm1, %v1846_v59, 0  ;;  %2983 = vrot.lane.b32.xlu1 %v5008_v22, %s4368_s18  ;;  %v5048_v50 = vld [vmem:[#allocation2 + $0x3e0] sm:$0xff]  }
 0x22c   :  { %4134 = vmatprep.subr.msk.bf16.mxu1 %vm812_vm1, %v1870_v53  ;;  %2967 = vrot.lane.b32.xlu0 %v5010_v23, %s4368_s18  ;;  %v5058_v53 = vld [vmem:[#allocation2 + $0x420] sm:$0xff]  }
 0x22e   :  { %3782 = vmatpush3.bf16.xpose.msra.mxu0 %v1945_v43  ;;  %v1906_v63 = vpop.permute.xlu1 %1905  ;;  %v4994_v0 = vpop.permute.xlu0 %1889  ;;  %v5018_v43 = vld [vmem:[#allocation2 + $0x3b0] sm:$0xff]  }
 0x22f   :  { %4126 = vmatprep.subr.msk.bf16.mxu0 %vm812_vm1, %v1838_v45  ;;  %2949 = vrot.lane.b32.xlu1 %v5016_v42, %s4368_s18  ;;  %v5026_v45 = vld [vmem:[#allocation2 + $0x430] sm:$0xff]  }
 0x230   :  { %2933 = vrot.lane.b32.xlu0 %v5018_v43, %s4368_s18 }
 0x232   :  { %v1860_v1 = vpop.permute.xlu1 %1859  ;;  %v1844_v2 = vpop.permute.xlu0 %1843 }
 0x233   :  { %3802 = vmatpush3.bf16.xpose.msra.mxu1 %v1990_v6  ;;  %v1975_v3 = vsel %vm812_vm1, %v1844_v2, 0  ;;  %2981 = vrot.lane.b32.xlu1 %v5024_v44, %s4368_s18  ;;  %v5072_v6 = vld [vmem:[#allocation2 + $0x458] sm:$0xff]  }
 0x234   :  { %4135 = vmatprep.subr.msk.bf16.mxu1 %vm812_vm1, %v1868_v11  ;;  %2965 = vrot.lane.b32.xlu0 %v5026_v45, %s4368_s18  ;;  %v5082_v11 = vld [vmem:[#allocation2 + $0x390] sm:$0xff]  }
 0x236   :  { %3784 = vmatpush3.bf16.xpose.msra.mxu0 %v1942_v49  ;;  %v5042_v49 = vld [vmem:[#allocation2 + $0x428] sm:$0xff]  }
 0x237   :  { %4127 = vmatprep.subr.msk.bf16.mxu0 %vm812_vm1, %v1836_v51  ;;  %2947 = vrot.lane.b32.xlu1 %v5032_v46, %s4368_s18  ;;  %v5050_v51 = vld [vmem:[#allocation2 + $0x3a0] sm:$0xff]  }
 0x238   :  { %2931 = vrot.lane.b32.xlu0 %v5034_v47, %s4368_s18 }
 0x23b   :  { %3804 = vmatpush3.bf16.xpose.msra.mxu1 %v1987_v24  ;;  %2979 = vrot.lane.b32.xlu1 %v5040_v48, %s4368_s18 }
 0x23c   :  { %4136 = vmatprep.subr.msk.bf16.mxu1 %vm812_vm1, %v1866_v27  ;;  %2963 = vrot.lane.b32.xlu0 %v5042_v49, %s4368_s18 }
 0x23e   :  { %3786 = vmatpush3.bf16.xpose.msra.mxu0 %v1939_v5  ;;  %v5066_v5 = vld [vmem:[#allocation2 + $0x398] sm:$0xff]  }
 0x23f   :  { %4128 = vmatprep.subr.msk.bf16.mxu0 %vm812_vm1, %v1834_v9  ;;  %2945 = vrot.lane.b32.xlu1 %v5048_v50, %s4368_s18  ;;  %v5074_v9 = vld [vmem:[#allocation2 + $0x418] sm:$0xff]  }
 0x240   :  { %2929 = vrot.lane.b32.xlu0 %v5050_v51, %s4368_s18 }
 0x243   :  { %3806 = vmatpush3.bf16.xpose.msra.mxu1 %v1984_v30  ;;  %2977 = vrot.lane.b32.xlu1 %v5056_v52, %s4368_s18 }
 0x244   :  { %4137 = vmatprep.subr.msk.bf16.mxu1 %vm812_vm1, %v1864_v33  ;;  %2961 = vrot.lane.b32.xlu0 %v5058_v53, %s4368_s18 }
 0x246   :  { %3788 = vmatpush3.bf16.xpose.msra.mxu0 %v1936_v15  ;;  %v5090_v15 = vld [vmem:[#allocation2 + $0x410] sm:$0xff]  }
 0x247   :  { %4129 = vmatprep.subr.msk.bf16.mxu0 %vm812_vm1, %v1832_v25  ;;  %2943 = vrot.lane.b32.xlu1 %v5064_v56, %s4368_s18  ;;  %v3441_v25 = vld [vmem:[%s5407_s2 + $0x1] ss:$0 sm:$0xff] }
 0x248   :  { %2927 = vrot.lane.b32.xlu0 %v5066_v5, %s4368_s18 }
 0x24b   :  { %3808 = vmatpush3.bf16.xpose.msra.mxu1 %v1981_v36  ;;  %2975 = vrot.lane.b32.xlu1 %v5072_v6, %s4368_s18  ;;  %v1888_v36 = vpop.permute.xlu0 %1887 }
 0x24c   :  { %4138 = vmatprep.subr.msk.bf16.mxu1 %vm812_vm1, %v1862_v62  ;;  %2959 = vrot.lane.b32.xlu0 %v5074_v9, %s4368_s18  ;;  %v1904_v62 = vpop.permute.xlu1 %1903 }
 0x24e   :  { %3790 = vmatpush3.bf16.xpose.msra.mxu0 %v1933_v29 }
 0x24f   :  { %4130 = vmatprep.subr.msk.bf16.mxu0 %vm812_vm1, %v1830_v31  ;;  %2941 = vrot.lane.b32.xlu1 %v5080_v10, %s4368_s18 }
 0x250   :  { %2925 = vrot.lane.b32.xlu0 %v5082_v11, %s4368_s18  ;;  %v1886_v2 = vpop.permute.xlu1 %1885 }
 0x253   :  { %3810 = vmatpush3.bf16.xpose.msra.mxu1 %v1978_v61  ;;  %2973 = vrot.lane.b32.xlu1 %v5088_v12, %s4368_s18 }
 0x254   :  { %4139 = vmatprep.subr.msk.bf16.mxu1 %vm812_vm1, %v1860_v1  ;;  %2957 = vrot.lane.b32.xlu0 %v5090_v15, %s4368_s18 }
 0x256   :  { %3792 = vmatpush3.bf16.xpose.msra.mxu0 %v1930_v35 }
 0x257   :  { %4131 = vmatprep.subr.msk.bf16.mxu0 %vm812_vm1, %v1828_v41 }
 0x25b   :  { %3812 = vmatpush3.bf16.xpose.msra.mxu1 %v1975_v3 }
 0x25c   :  { %4040 = vmatprep.subr.bf16.mxu1 %v4370_v39 }
 0x25e   :  { %3794 = vmatpush3.bf16.xpose.msra.mxu0 %v1927_v60 }
 0x25f   :  { %4140 = vmatprep.subr.msk.bf16.mxu0 %vm812_vm1, %v1906_v63  ;;  %v1922_v63 = vpop.permute.xlu0 %1921 }
 0x260   :  { %v2092_v3 = vsel %vm812_vm1, %v1922_v63, 0 }
 0x2a5   :  { %v3720_v7 = vpop.f32.mrf.mxu0  ;;  %v3742_v8 = vpop.f32.mrf.mxu1 }
 0x2a7   :  { %v3721_v13 = vpop.f32.mrf.mxu0  ;;  %v3743_v14 = vpop.f32.mrf.mxu1 }
 0x2a8   :  { %v3722_v24 = vadd.f32 %v3721_v13, %v3720_v7  ;;  %v3744_v30 = vadd.f32 %v3743_v14, %v3742_v8  ;;  %v1902_v7 = vpop.permute.xlu0 %1901  ;;  %v2044_v8 = vsel %vm812_vm1, %v4994_v0, 0  ;;  %v1920_v13 = vpop.permute.xlu1 %1919 }
 0x2a9   :  { %v3723_v16 = vpop.f32.mrf.mxu0  ;;  %v3745_v17 = vpop.f32.mrf.mxu1  ;;  %v2089_v14 = vsel %vm812_vm1, %v1920_v13, 0  ;;  %v4313_v13 = vld [vmem:[#allocation2 + $0x3c8] sm:$0xff]  }
 0x2aa   :  { %v1646_v27 = vadd.f32 %v3722_v24, %v3441_v25  ;;  %v2041_v17 = vsel %vm812_vm1, %v1888_v36, 0  ;;  %2939 = vrot.lane.b32.xlu1 %v4313_v13, %s4368_s18 }
 0x2ab   :  { %v3724_v18 = vpop.f32.mrf.mxu0  ;;  %v3746_v19 = vpop.f32.mrf.mxu1 }
 0x2ac   :  { %v1686_v33 = vadd.f32 %v3744_v30, %v1646_v27  ;;  %v1884_v0 = vpop.permute.xlu0 %1883  ;;  %v1900_v16 = vpop.permute.xlu1 %1899 }
 0x2b0   :  { %v1918_v18 = vpop.permute.xlu0 %1917  ;;  %v1882_v19 = vpop.permute.xlu1 %1881 }
 0x2b1   :  { %v2086_v24 = vsel %vm812_vm1, %v1918_v18, 0  ;;  %v2032_v36 = vsel %vm812_vm1, %v1882_v19, 0  ;;  %v4342_v18 = vld [vmem:[#allocation2 + $0x500] sm:$0xff]  }
 0x2b2   :  { %v4343_v19 = vld [vmem:[#allocation2 + $0x4c0] sm:$0xff]  }
 0x2b4   :  { %v1898_v25 = vpop.permute.xlu0 %1897  ;;  %v1916_v27 = vpop.permute.xlu1 %1915 }
 0x2b8   :  { %v1896_v30 = vpop.permute.xlu1 %1895 }
 0x2e2   :  { %v1765_v26 = vpop.f32.mrf.mxu1 }
 0x2e4   :  { %v4038_v28 = vpop.f32.mrf.mxu1 }
 0x2e5   :  { %v3764_v29 = vpop.f32.mrf.mxu0  ;;  %v1880_v28 = vpop.permute.xlu0 %1879 }
 0x2e6   :  { %v1768_v31 = vpop.f32.mrf.mxu1 }
 0x2e7   :  { %v3765_v32 = vpop.f32.mrf.mxu0  ;;  %v2035_v31 = vsel %vm812_vm1, %v1884_v0, 0  ;;  %v4315_v0 = vld [vmem:[#allocation2 + $0x388] sm:$0xff]  }
 0x2e8   :  { %v3766_v34 = vadd.f32 %v3765_v32, %v3764_v29  ;;  %v4039_v35 = vpop.f32.mrf.mxu1  ;;  %v2083_v29 = vsel %vm812_vm1, %v1916_v27, 0  ;;  %2923 = vrot.lane.b32.xlu0 %v4315_v0, %s4368_s18 }
 0x2e9   :  { %v3767_v41 = vpop.f32.mrf.mxu0  ;;  %v1914_v32 = vpop.permute.xlu0 %1913 }
 0x2ea   :  { %v1726_v58 = vadd.f32 %v3766_v34, %v1686_v33  ;;  %v1878_v33 = vpop.permute.xlu1 %1877  ;;  %v2080_v34 = vsel %vm812_vm1, %v1914_v32, 0 }
 0x2eb   :  { %v3768_v59 = vpop.f32.mrf.mxu0 }
 0x2ec   :  { %v1766_v60 = vadd.f32 %v1765_v26, %v1726_v58  ;;  %v2038_v26 = vsel %vm812_vm1, %v1886_v2, 0  ;;  %v2029_v59 = vsel %vm812_vm1, %v1880_v28, 0  ;;  %v2026_v2 = vsel %vm812_vm1, %v1878_v33, 0 }
 0x2ed   :  { %v1894_v35 = vpop.permute.xlu0 %1893 }
 0x2ee   :  { %v1771_v61 = vmax.f32 %v1766_v60, 0.0  ;;  %v1912_v41 = vpop.permute.xlu1 %1911 }
 0x2f0   :  { %v5099_v1 = vpack.c.bf16 %v1771_v61, %v1771_v61 }
 0x2f1   :  { %v1876_v58 = vpop.permute.xlu0 %1875 }
 0x2f2   :  { %3795 = vmatprep.mubr.msk.bf16.mxu0 %vm812_vm1, %v5099_v1  ;;  %3813 = vmatprep.mubr.msk.bf16.mxu1 %vm812_vm1, %v5099_v1  ;;  %v1892_v61 = vpop.permute.xlu1 %1891 }
 0x2f3   :  { %3796 = vmatmul.mubr.msk.bf16.vlgmr.msra.gmra.mxu0 %vm812_vm1, %v5099_v1  ;;  %3814 = vmatmul.mubr.msk.bf16.vlgmr.msra.gmra.mxu1 %vm812_vm1, %v5099_v1 }
 0x2f4   :  { %3816 = vmatpush3.bf16.xpose.msra.mxu0 %v2044_v8  ;;  %4041 = vmatpush3.bf16.xpose.msra.mxu1 %v2092_v3  ;;  %v2023_v8 = vsel %vm812_vm1, %v1876_v58, 0 }
 0x2f5   :  { %3831 = vmatprep.mubr.msk.bf16.mxu0 %vm812_vm1, %v5099_v1  ;;  %4141 = vmatprep.subr.msk.bf16.mxu0 %vm812_vm1, %v1904_v62  ;;  %v2077_v62 = vsel %vm812_vm1, %v1912_v41, 0  ;;  %v1910_v60 = vpop.permute.xlu0 %1909 }
 0x2f6   :  { %4042 = vmatprep.subr.bf16.mxu1 %v4370_v39  ;;  %4056 = vmatprep.mubr.msk.bf16.mxu1 %vm4371_vm0, %v4370_v39  ;;  %v2074_v63 = vsel %vm812_vm1, %v1910_v60, 0  ;;  %v1908_v3 = vpop.permute.xlu1 %1907 }
 0x2fc   :  { %3818 = vmatpush3.bf16.xpose.msra.mxu0 %v2041_v17  ;;  %4043 = vmatpush3.bf16.xpose.msra.mxu1 %v2089_v14  ;;  %v4341_v14 = vld [vmem:[#allocation2 + $0x488] sm:$0xff]   ;;  %v4344_v17 = vld [vmem:[#allocation2 + $0x480] sm:$0xff]  }
 0x2fd   :  { %4142 = vmatprep.subr.msk.bf16.mxu0 %vm812_vm1, %v1902_v7  ;;  %4044 = vmatprep.subr.bf16.mxu1 %v4370_v39  ;;  %v2071_v7 = vsel %vm812_vm1, %v1908_v3, 0 }
 0x304   :  { %3820 = vmatpush3.bf16.xpose.msra.mxu0 %v2038_v26  ;;  %4045 = vmatpush3.bf16.xpose.msra.mxu1 %v2086_v24  ;;  %v5250_v24 = vld [vmem:[%s5408_s3 + $0x7] sm:$0xff] }
 0x305   :  { %4143 = vmatprep.subr.msk.bf16.mxu0 %vm812_vm1, %v1900_v16  ;;  %4046 = vmatprep.subr.bf16.mxu1 %v4370_v39  ;;  %v4339_v16 = vld [vmem:[#allocation2 + $0x508] sm:$0xff]   ;;  %v1787_v26 = vrot.slane %v5250_v24, %v4904_v55  ;;  %v1783_v27 = vrot.slane %v5250_v24, %v4911_v57  ;;  %v1791_v28 = vrot.slane %v5250_v24, %v4913_v4 }
 0x306   :  { %v1803_v3 = vrot.slane %v5250_v24, %v4952_v37 }
 0x30c   :  { %3822 = vmatpush3.bf16.xpose.msra.mxu0 %v2035_v31  ;;  %4047 = vmatpush3.bf16.xpose.msra.mxu1 %v2083_v29 }
 0x30d   :  { %4144 = vmatprep.subr.msk.bf16.mxu0 %vm812_vm1, %v1898_v25  ;;  %4048 = vmatprep.subr.bf16.mxu1 %v4370_v39  ;;  %v1779_v25 = vrot.slane %v5250_v24, %v4902_v54 }
 0x314   :  { %3824 = vmatpush3.bf16.xpose.msra.mxu0 %v2032_v36  ;;  %4049 = vmatpush3.bf16.xpose.msra.mxu1 %v2080_v34 }
 0x315   :  { %4145 = vmatprep.subr.msk.bf16.mxu0 %vm812_vm1, %v1896_v30  ;;  %4050 = vmatprep.subr.bf16.mxu1 %v4370_v39 }
 0x31c   :  { %3826 = vmatpush3.bf16.xpose.msra.mxu0 %v2029_v59  ;;  %4051 = vmatpush3.bf16.xpose.msra.mxu1 %v2077_v62 }
 0x31d   :  { %4146 = vmatprep.subr.msk.bf16.mxu0 %vm812_vm1, %v1894_v35  ;;  %4052 = vmatprep.subr.bf16.mxu1 %v4370_v39 }
 0x324   :  { %3828 = vmatpush3.bf16.xpose.msra.mxu0 %v2026_v2  ;;  %4053 = vmatpush3.bf16.xpose.msra.mxu1 %v2074_v63 }
 0x325   :  { %4147 = vmatprep.subr.msk.bf16.mxu0 %vm812_vm1, %v1892_v61  ;;  %4054 = vmatprep.subr.bf16.mxu1 %v4370_v39 }
 0x32c   :  { %3830 = vmatpush3.bf16.xpose.msra.mxu0 %v2023_v8  ;;  %4055 = vmatpush3.bf16.xpose.msra.mxu1 %v2071_v7  ;;  %v1795_v7 = vrot.slane %v5250_v24, %v4954_v38  ;;  %v1799_v8 = vrot.slane %v5250_v24, %v4956_v40 }
 0x32d   :  { %3842 = vmatprep.subr.bf16.mxu0 %v5000_v20  ;;  %3864 = vmatprep.subr.bf16.mxu1 %v5008_v22  ;;  %v4314_v20 = vld [vmem:[#allocation2 + $0x448] sm:$0xff]  }
 0x32e   :  { %v4316_v22 = vld [vmem:[#allocation2 + $0x408] sm:$0xff]   ;;  %2971 = vrot.lane.b32.xlu1 %v4314_v20, %s4368_s18 }
 0x32f   :  { %2955 = vrot.lane.b32.xlu0 %v4316_v22, %s4368_s18 }
 0x333   :  { %3832 = vmatmul.mubr.msk.bf16.vlgmr.msra.gmra.mxu0 %vm812_vm1, %v5099_v1  ;;  %4057 = vmatmul.mubr.msk.bf16.vlgmr.msra.gmra.mxu1 %vm812_vm1, %v5099_v1  ;;  %v4340_v1 = vld [vmem:[#allocation2 + $0x4c8] sm:$0xff]  }
 0x334   :  { %3843 = vmatpush3.bf16.msra.mxu0 %v5002_v21  ;;  %3865 = vmatpush3.bf16.msra.mxu1 %v5010_v23  ;;  %v4317_v21 = vld [vmem:[#allocation2 + $0x3c0] sm:$0xff]  }
 0x335   :  { %3844 = vmatprep.subr.bf16.mxu0 %v5016_v42  ;;  %3866 = vmatprep.subr.bf16.mxu1 %v5024_v44  ;;  %v4319_v23 = vld [vmem:[#allocation2 + $0x380] sm:$0xff]   ;;  %v4322_v44 = vld [vmem:[#allocation2 + $0x4f8] sm:$0xff]  }
 0x336   :  { %2937 = vrot.lane.b32.xlu1 %v4317_v21, %s4368_s18  ;;  %2921 = vrot.lane.b32.xlu0 %v4319_v23, %s4368_s18  ;;  %v4318_v42 = vld [vmem:[#allocation2 + $0x440] sm:$0xff]  }
 0x338   :  { %3845 = vmatpush3.bf16.msra.mxu0 %v5018_v43  ;;  %3867 = vmatpush3.bf16.msra.mxu1 %v5026_v45  ;;  %v4320_v43 = vld [vmem:[#allocation2 + $0x400] sm:$0xff]   ;;  %v5176_v45 = vld [vmem:[#allocation2 + $0x4b8] sm:$0xff]  }
 0x339   :  { %3846 = vmatprep.subr.bf16.mxu0 %v5032_v46  ;;  %3868 = vmatprep.subr.bf16.mxu1 %v5040_v48  ;;  %v5185_v46 = vld [vmem:[#allocation2 + $0x538] sm:$0xff]   ;;  %v5193_v48 = vld [vmem:[#allocation2 + $0x530] sm:$0xff]  }
 0x33a   :  { %2969 = vrot.lane.b32.xlu1 %v4318_v42, %s4368_s18  ;;  %2953 = vrot.lane.b32.xlu0 %v4320_v43, %s4368_s18 }
 0x33c   :  { %3847 = vmatpush3.bf16.msra.mxu0 %v5034_v47  ;;  %3869 = vmatpush3.bf16.msra.mxu1 %v5042_v49  ;;  %v5187_v47 = vld [vmem:[#allocation2 + $0x4b0] sm:$0xff]  }
 0x33d   :  { %3848 = vmatprep.subr.bf16.mxu0 %v5048_v50  ;;  %3870 = vmatprep.subr.bf16.mxu1 %v5056_v52  ;;  %v5195_v49 = vld [vmem:[#allocation2 + $0x4f0] sm:$0xff]   ;;  %v5201_v50 = vld [vmem:[#allocation2 + $0x4e8] sm:$0xff]  }
 0x33e   :  { %2999 = vrot.lane.b32.xlu0 %v5176_v45, %s4368_s18  ;;  %3015 = vrot.lane.b32.xlu1 %v4322_v44, %s4368_s18  ;;  %v5210_v52 = vld [vmem:[#allocation2 + $0x528] sm:$0xff]  }
 0x340   :  { %3849 = vmatpush3.bf16.msra.mxu0 %v5050_v51  ;;  %3871 = vmatpush3.bf16.msra.mxu1 %v5058_v53  ;;  %v5203_v51 = vld [vmem:[#allocation2 + $0x4a8] sm:$0xff]   ;;  %v5212_v53 = vld [vmem:[#allocation2 + $0x4a0] sm:$0xff]  }
 0x341   :  { %3850 = vmatprep.subr.bf16.mxu0 %v5064_v56  ;;  %3872 = vmatprep.subr.bf16.mxu1 %v5072_v6  ;;  %v5218_v56 = vld [vmem:[#allocation2 + $0x520] sm:$0xff]   ;;  %v5226_v6 = vld [vmem:[#allocation2 + $0x4d8] sm:$0xff]  }
 0x342   :  { %3031 = vrot.lane.b32.xlu0 %v5185_v46, %s4368_s18  ;;  %2997 = vrot.lane.b32.xlu1 %v5187_v47, %s4368_s18 }
 0x344   :  { %3851 = vmatpush3.bf16.msra.mxu0 %v5066_v5  ;;  %3873 = vmatpush3.bf16.msra.mxu1 %v5074_v9  ;;  %v5220_v5 = vld [vmem:[#allocation2 + $0x4e0] sm:$0xff]   ;;  %v5228_v9 = vld [vmem:[#allocation2 + $0x498] sm:$0xff]  }
 0x345   :  { %3852 = vmatprep.subr.bf16.mxu0 %v5080_v10  ;;  %3874 = vmatprep.subr.bf16.mxu1 %v5088_v12  ;;  %v4333_v10 = vld [vmem:[#allocation2 + $0x518] sm:$0xff]   ;;  %v4336_v12 = vld [vmem:[#allocation2 + $0x510] sm:$0xff]  }
 0x346   :  { %3029 = vrot.lane.b32.xlu1 %v5193_v48, %s4368_s18  ;;  %3013 = vrot.lane.b32.xlu0 %v5195_v49, %s4368_s18 }
 0x348   :  { %3853 = vmatpush3.bf16.msra.mxu0 %v5082_v11  ;;  %3875 = vmatpush3.bf16.msra.mxu1 %v5090_v15  ;;  %v5234_v11 = vld [vmem:[#allocation2 + $0x490] sm:$0xff]  }
 0x349   :  { %3854 = vmatprep.subr.bf16.mxu0 %v4313_v13  ;;  %3876 = vmatprep.subr.bf16.mxu1 %v4314_v20  ;;  %v4337_v15 = vld [vmem:[#allocation2 + $0x4d0] sm:$0xff]  }
 0x34a   :  { %2995 = vrot.lane.b32.xlu0 %v5203_v51, %s4368_s18  ;;  %3011 = vrot.lane.b32.xlu1 %v5201_v50, %s4368_s18 }
 0x34c   :  { %3855 = vmatpush3.bf16.msra.mxu0 %v4315_v0  ;;  %3877 = vmatpush3.bf16.msra.mxu1 %v4316_v22 }
 0x34d   :  { %3856 = vmatprep.subr.bf16.mxu0 %v4317_v21  ;;  %3878 = vmatprep.subr.bf16.mxu1 %v4318_v42 }
 0x34e   :  { %3027 = vrot.lane.b32.xlu0 %v5210_v52, %s4368_s18  ;;  %2993 = vrot.lane.b32.xlu1 %v5212_v53, %s4368_s18 }
 0x350   :  { %3857 = vmatpush3.bf16.msra.mxu0 %v4319_v23  ;;  %3879 = vmatpush3.bf16.msra.mxu1 %v4320_v43 }
 0x351   :  { %4060 = vmatprep.subr.bf16.mxu1 %v4370_v39  ;;  %3886 = vmatprep.subr.bf16.mxu0 %v4322_v44 }
 0x352   :  { %3025 = vrot.lane.b32.xlu1 %v5218_v56, %s4368_s18  ;;  %3009 = vrot.lane.b32.xlu0 %v5220_v5, %s4368_s18 }
 0x356   :  { %2991 = vrot.lane.b32.xlu0 %v5228_v9, %s4368_s18  ;;  %3007 = vrot.lane.b32.xlu1 %v5226_v6, %s4368_s18 }
 0x35a   :  { %3023 = vrot.lane.b32.xlu0 %v4333_v10, %s4368_s18  ;;  %2989 = vrot.lane.b32.xlu1 %v5234_v11, %s4368_s18 }
 0x35e   :  { %3021 = vrot.lane.b32.xlu1 %v4336_v12, %s4368_s18  ;;  %3005 = vrot.lane.b32.xlu0 %v4337_v15, %s4368_s18 }
 0x362   :  { %3003 = vrot.lane.b32.xlu1 %v4340_v1, %s4368_s18  ;;  %2987 = vrot.lane.b32.xlu0 %v4341_v14, %s4368_s18 }
 0x366   :  { %3019 = vrot.lane.b32.xlu0 %v4339_v16, %s4368_s18  ;;  %2985 = vrot.lane.b32.xlu1 %v4344_v17, %s4368_s18 }
 0x36a   :  { %3017 = vrot.lane.b32.xlu1 %v4342_v18, %s4368_s18  ;;  %3001 = vrot.lane.b32.xlu0 %v4343_v19, %s4368_s18 }
 0x3b3   :  { %v2128_v29 = vpop.f32.mrf.mxu0  ;;  %v2169_v30 = vpop.f32.mrf.mxu1 }
 0x3b4   :  { %v2129_v31 = vadd.f32 %v2128_v29, %v1779_v25  ;;  %v2170_v32 = vadd.f32 %v2169_v30, %v1787_v26 }
 0x3b5   :  { %v2130_v33 = vpop.f32.mrf.mxu0  ;;  %v2171_v34 = vpop.f32.mrf.mxu1 }
 0x3b6   :  { %v2131_v35 = vadd.f32 %v2130_v33, %v1783_v27  ;;  %v2172_v36 = vadd.f32 %v2171_v34, %v1791_v28  ;;  %v2370_v60 = vpack.c.bf16 %v2129_v31, %v2129_v31  ;;  %v2372_v61 = vpack.c.bf16 %v2170_v32, %v2170_v32 }
 0x3b7   :  { %v2132_v41 = vpop.f32.mrf.mxu0  ;;  %v2173_v58 = vpop.f32.mrf.mxu1 }
 0x3b8   :  { %v2371_v62 = vpack.c.bf16 %v2131_v35, %v2131_v35  ;;  %v2373_v59 = vpack.c.bf16 %v2172_v36, %v2172_v36 }
 0x3b9   :  { %v2133_v63 = vpop.f32.mrf.mxu0  ;;  %v2174_v2 = vpop.f32.mrf.mxu1 }
 0x3ba   :  { %2753 = vmatprep.mubr.bf16.mxu0 %v2371_v62  ;;  %2793 = vmatprep.mubr.bf16.mxu1 %v2373_v59 }
 0x3bb   :  { %2754 = vmatmul.mubr.bf16.vlgmr.msra.gmra.mxu0 %v2370_v60  ;;  %2794 = vmatmul.mubr.bf16.vlgmr.msra.gmra.mxu1 %v2372_v61 }
 0x3bc   :  { %4061 = vmatpush3.bf16.msra.mxu1 %v5185_v46  ;;  %3887 = vmatpush3.bf16.msra.mxu0 %v5176_v45 }
 0x3bd   :  { %4062 = vmatprep.subr.bf16.mxu1 %v4370_v39  ;;  %3888 = vmatprep.subr.bf16.mxu0 %v5195_v49 }
 0x3be   :  { %4076 = vmatprep.mubr.msk.bf16.mxu1 %vm4371_vm0, %v4370_v39 }
 0x3c0   :  { %4063 = vmatpush3.bf16.msra.mxu1 %v5193_v48  ;;  %3889 = vmatpush3.bf16.msra.mxu0 %v5187_v47 }
 0x3c1   :  { %4064 = vmatprep.subr.bf16.mxu1 %v4370_v39  ;;  %3890 = vmatprep.subr.bf16.mxu0 %v5201_v50  ;;  %v2952_v50 = vpop.permute.xlu1 %2951 }
 0x3c4   :  { %4065 = vmatpush3.bf16.msra.mxu1 %v5210_v52  ;;  %3891 = vmatpush3.bf16.msra.mxu0 %v5203_v51  ;;  %v2936_v51 = vpop.permute.xlu0 %2935 }
 0x3c5   :  { %4066 = vmatprep.subr.bf16.mxu1 %v4370_v39  ;;  %3892 = vmatprep.subr.bf16.mxu0 %v5220_v5  ;;  %v3058_v52 = vsel %vm812_vm1, %v2936_v51, 0 }
 0x3c8   :  { %4067 = vmatpush3.bf16.msra.mxu1 %v5218_v56  ;;  %3893 = vmatpush3.bf16.msra.mxu0 %v5212_v53  ;;  %v2984_v53 = vpop.permute.xlu1 %2983  ;;  %v2968_v56 = vpop.permute.xlu0 %2967 }
 0x3c9   :  { %4068 = vmatprep.subr.bf16.mxu1 %v4370_v39  ;;  %3894 = vmatprep.subr.bf16.mxu0 %v5226_v6  ;;  %v3106_v5 = vsel %vm812_vm1, %v2968_v56, 0 }
 0x3cc   :  { %4069 = vmatpush3.bf16.msra.mxu1 %v4333_v10  ;;  %3895 = vmatpush3.bf16.msra.mxu0 %v5228_v9  ;;  %v2950_v6 = vpop.permute.xlu1 %2949  ;;  %v2934_v9 = vpop.permute.xlu0 %2933 }
 0x3cd   :  { %4070 = vmatprep.subr.bf16.mxu1 %v4370_v39  ;;  %3896 = vmatprep.subr.bf16.mxu0 %v4337_v15  ;;  %v3055_v10 = vsel %vm812_vm1, %v2934_v9, 0 }
 0x3d0   :  { %4071 = vmatpush3.bf16.msra.mxu1 %v4336_v12  ;;  %3897 = vmatpush3.bf16.msra.mxu0 %v5234_v11  ;;  %v2982_v11 = vpop.permute.xlu1 %2981  ;;  %v2966_v12 = vpop.permute.xlu0 %2965 }
 0x3d1   :  { %4072 = vmatprep.subr.bf16.mxu1 %v4370_v39  ;;  %3898 = vmatprep.subr.bf16.mxu0 %v4340_v1  ;;  %v3103_v15 = vsel %vm812_vm1, %v2966_v12, 0 }
 0x3d4   :  { %4073 = vmatpush3.bf16.msra.mxu1 %v4339_v16  ;;  %3899 = vmatpush3.bf16.msra.mxu0 %v4341_v14  ;;  %v2948_v1 = vpop.permute.xlu1 %2947  ;;  %v2932_v14 = vpop.permute.xlu0 %2931 }
 0x3d5   :  { %4074 = vmatprep.subr.bf16.mxu1 %v4370_v39  ;;  %3900 = vmatprep.subr.bf16.mxu0 %v4343_v19  ;;  %v3052_v16 = vsel %vm812_vm1, %v2932_v14, 0 }
 0x3d8   :  { %4075 = vmatpush3.bf16.msra.mxu1 %v4342_v18  ;;  %3901 = vmatpush3.bf16.msra.mxu0 %v4344_v17  ;;  %v2980_v17 = vpop.permute.xlu1 %2979  ;;  %v2964_v18 = vpop.permute.xlu0 %2963 }
 0x3d9   :  { %4148 = vmatprep.subr.msk.bf16.mxu0 %vm812_vm1, %v2952_v50  ;;  %4156 = vmatprep.subr.msk.bf16.mxu1 %vm812_vm1, %v2984_v53  ;;  %v3100_v19 = vsel %vm812_vm1, %v2964_v18, 0 }
 0x3dc   :  { %v2946_v24 = vpop.permute.xlu1 %2945  ;;  %v2930_v25 = vpop.permute.xlu0 %2929 }
 0x3dd   :  { %v3049_v26 = vsel %vm812_vm1, %v2930_v25, 0 }
 0x3e0   :  { %v2978_v27 = vpop.permute.xlu1 %2977  ;;  %v2962_v28 = vpop.permute.xlu0 %2961 }
 0x3e1   :  { %v3097_v29 = vsel %vm812_vm1, %v2962_v28, 0 }
 0x3e4   :  { %v2944_v30 = vpop.permute.xlu1 %2943  ;;  %v2928_v31 = vpop.permute.xlu0 %2927 }
 0x3e5   :  { %v3046_v32 = vsel %vm812_vm1, %v2928_v31, 0 }
 0x3e8   :  { %v2976_v33 = vpop.permute.xlu1 %2975  ;;  %v2960_v34 = vpop.permute.xlu0 %2959 }
 0x3e9   :  { %v3094_v35 = vsel %vm812_vm1, %v2960_v34, 0 }
 0x3ec   :  { %v2942_v36 = vpop.permute.xlu1 %2941  ;;  %v2926_v41 = vpop.permute.xlu0 %2925 }
 0x3ed   :  { %v3043_v58 = vsel %vm812_vm1, %v2926_v41, 0 }
 0x3f0   :  { %v2974_v62 = vpop.permute.xlu1 %2973  ;;  %v2958_v59 = vpop.permute.xlu0 %2957 }
 0x3f1   :  { %v3091_v60 = vsel %vm812_vm1, %v2958_v59, 0 }
 0x3f3   :  { %v2210_v13 = vpop.f32.mrf.mxu0  ;;  %v2251_v0 = vpop.f32.mrf.mxu1 }
 0x3f4   :  { %v2252_v20 = vadd.f32 %v2251_v0, %v1803_v3  ;;  %v2211_v22 = vadd.f32 %v2210_v13, %v1795_v7  ;;  %v2940_v61 = vpop.permute.xlu1 %2939  ;;  %v2924_v63 = vpop.permute.xlu0 %2923 }
 0x3f5   :  { %v2212_v21 = vpop.f32.mrf.mxu0  ;;  %v4058_v23 = vpop.f32.mrf.mxu1  ;;  %v3040_v2 = vsel %vm812_vm1, %v2924_v63, 0 }
 0x3f6   :  { %v2376_v42 = vpack.c.bf16 %v2252_v20, %v2252_v20  ;;  %v2213_v43 = vadd.f32 %v2212_v21, %v1799_v8  ;;  %v2374_v47 = vpack.c.bf16 %v2211_v22, %v2211_v22 }
 0x3f7   :  { %v2214_v44 = vpop.f32.mrf.mxu0  ;;  %v2254_v45 = vpop.f32.mrf.mxu1 }
 0x3f8   :  { %v2375_v46 = vpack.c.bf16 %v2213_v43, %v2213_v43  ;;  %4077 = vmatmul.mubr.bf16.vlgmr.msra.gmra.mxu1 %v2376_v42  ;;  %v2972_v3 = vpop.permute.xlu1 %2971  ;;  %v2956_v7 = vpop.permute.xlu0 %2955 }
 0x3f9   :  { %v2215_v48 = vpop.f32.mrf.mxu0  ;;  %v4059_v49 = vpop.f32.mrf.mxu1  ;;  %3936 = vmatpush3.bf16.xpose.msra.mxu1 %v3106_v5  ;;  %v3088_v8 = vsel %vm812_vm1, %v2956_v7, 0 }
 0x3fa   :  { %2833 = vmatprep.mubr.bf16.mxu0 %v2375_v46  ;;  %4157 = vmatprep.subr.msk.bf16.mxu1 %vm812_vm1, %v2982_v11 }
 0x3fb   :  { %2834 = vmatmul.mubr.bf16.vlgmr.msra.gmra.mxu0 %v2374_v47 }
 0x3fc   :  { %3918 = vmatpush3.bf16.xpose.msra.mxu0 %v3058_v52  ;;  %v2938_v13 = vpop.permute.xlu1 %2937  ;;  %v2922_v0 = vpop.permute.xlu0 %2921  ;;  %v3504_v52 = vld [vmem:[%s5407_s2 + $0x2] ss:$0 sm:$0xff] }
 0x3fd   :  { %4149 = vmatprep.subr.msk.bf16.mxu0 %vm812_vm1, %v2950_v6  ;;  %v3037_v20 = vsel %vm812_vm1, %v2922_v0, 0 }
 0x400   :  { %v2970_v22 = vpop.permute.xlu1 %2969  ;;  %v2954_v21 = vpop.permute.xlu0 %2953 }
 0x401   :  { %3938 = vmatpush3.bf16.xpose.msra.mxu1 %v3103_v15  ;;  %v3085_v23 = vsel %vm812_vm1, %v2954_v21, 0 }
 0x402   :  { %4158 = vmatprep.subr.msk.bf16.mxu1 %vm812_vm1, %v2980_v17 }
 0x404   :  { %3920 = vmatpush3.bf16.xpose.msra.mxu0 %v3055_v10  ;;  %v3016_v42 = vpop.permute.xlu1 %3015  ;;  %v3000_v14 = vpop.permute.xlu0 %2999 }
 0x405   :  { %4150 = vmatprep.subr.msk.bf16.mxu0 %vm812_vm1, %v2948_v1 }
 0x408   :  { %v3032_v25 = vpop.permute.xlu0 %3031 }
 0x409   :  { %3940 = vmatpush3.bf16.xpose.msra.mxu1 %v3100_v19  ;;  %v3202_v28 = vsel %vm812_vm1, %v3032_v25, 0 }
 0x40a   :  { %4159 = vmatprep.subr.msk.bf16.mxu1 %vm812_vm1, %v2978_v27  ;;  %v2998_v27 = vpop.permute.xlu1 %2997 }
 0x40c   :  { %3922 = vmatpush3.bf16.xpose.msra.mxu0 %v3052_v16 }
 0x40d   :  { %4151 = vmatprep.subr.msk.bf16.mxu0 %vm812_vm1, %v2946_v24 }
 0x40e   :  { %v3030_v31 = vpop.permute.xlu1 %3029 }
 0x411   :  { %3942 = vmatpush3.bf16.xpose.msra.mxu1 %v3097_v29  ;;  %v3014_v29 = vpop.permute.xlu0 %3013 }
 0x412   :  { %4160 = vmatprep.subr.msk.bf16.mxu1 %vm812_vm1, %v2976_v33  ;;  %v3199_v33 = vsel %vm812_vm1, %v3030_v31, 0  ;;  %v3012_v34 = vpop.permute.xlu1 %3011 }
 0x414   :  { %3924 = vmatpush3.bf16.xpose.msra.mxu0 %v3049_v26 }
 0x415   :  { %4152 = vmatprep.subr.msk.bf16.mxu0 %vm812_vm1, %v2944_v30  ;;  %v3154_v30 = vsel %vm812_vm1, %v3000_v14, 0 }
 0x416   :  { %v2994_v41 = vpop.permute.xlu1 %2993 }
 0x419   :  { %3944 = vmatpush3.bf16.xpose.msra.mxu1 %v3094_v35  ;;  %v3151_v35 = vsel %vm812_vm1, %v2998_v27, 0 }
 0x41a   :  { %4161 = vmatprep.subr.msk.bf16.mxu1 %vm812_vm1, %v2974_v62 }
 0x41c   :  { %3926 = vmatpush3.bf16.xpose.msra.mxu0 %v3046_v32  ;;  %v2996_v32 = vpop.permute.xlu0 %2995 }
 0x41d   :  { %4153 = vmatprep.subr.msk.bf16.mxu0 %vm812_vm1, %v2942_v36  ;;  %v3148_v59 = vsel %vm812_vm1, %v2996_v32, 0 }
 0x420   :  { %v3028_v36 = vpop.permute.xlu0 %3027 }
 0x421   :  { %3946 = vmatpush3.bf16.xpose.msra.mxu1 %v3091_v60  ;;  %v3026_v60 = vpop.permute.xlu1 %3025 }
 0x422   :  { %4162 = vmatprep.subr.msk.bf16.mxu1 %vm812_vm1, %v2972_v3  ;;  %v3193_v63 = vsel %vm812_vm1, %v3026_v60, 0  ;;  %v3145_v3 = vsel %vm812_vm1, %v2994_v41, 0 }
 0x424   :  { %3928 = vmatpush3.bf16.xpose.msra.mxu0 %v3043_v58  ;;  %v3196_v58 = vsel %vm812_vm1, %v3028_v36, 0  ;;  %v3010_v62 = vpop.permute.xlu0 %3009 }
 0x425   :  { %4154 = vmatprep.subr.msk.bf16.mxu0 %vm812_vm1, %v2940_v61 }
 0x428   :  { %v2992_v61 = vpop.permute.xlu0 %2991 }
 0x429   :  { %3948 = vmatpush3.bf16.xpose.msra.mxu1 %v3088_v8 }
 0x42a   :  { %4163 = vmatprep.subr.msk.bf16.mxu1 %vm812_vm1, %v2970_v22 }
 0x42c   :  { %3930 = vmatpush3.bf16.xpose.msra.mxu0 %v3040_v2  ;;  %v3008_v2 = vpop.permute.xlu1 %3007  ;;  %v3024_v7 = vpop.permute.xlu0 %3023 }
 0x42d   :  { %4155 = vmatprep.subr.msk.bf16.mxu0 %vm812_vm1, %v2938_v13  ;;  %v3190_v13 = vsel %vm812_vm1, %v3024_v7, 0 }
 0x430   :  { %v2990_v8 = vpop.permute.xlu1 %2989  ;;  %v3006_v0 = vpop.permute.xlu0 %3005 }
 0x431   :  { %3950 = vmatpush3.bf16.xpose.msra.mxu1 %v3085_v23 }
 0x432   :  { %4080 = vmatprep.subr.bf16.mxu1 %v4370_v39 }
 0x434   :  { %3932 = vmatpush3.bf16.xpose.msra.mxu0 %v3037_v20  ;;  %v3142_v20 = vsel %vm812_vm1, %v2992_v61, 0  ;;  %v3022_v22 = vpop.permute.xlu1 %3021  ;;  %v2988_v21 = vpop.permute.xlu0 %2987 }
 0x435   :  { %4164 = vmatprep.subr.msk.bf16.mxu0 %vm812_vm1, %v3016_v42  ;;  %v3187_v23 = vsel %vm812_vm1, %v3022_v22, 0 }
 0x438   :  { %v3004_v42 = vpop.permute.xlu1 %3003 }
 0x47b   :  { %v3858_v43 = vpop.f32.mrf.mxu0  ;;  %v3880_v44 = vpop.f32.mrf.mxu1 }
 0x47d   :  { %v3859_v45 = vpop.f32.mrf.mxu0  ;;  %v3881_v46 = vpop.f32.mrf.mxu1 }
 0x47e   :  { %v3860_v51 = vadd.f32 %v3859_v45, %v3858_v43  ;;  %v3882_v9 = vadd.f32 %v3881_v46, %v3880_v44  ;;  %v3139_v43 = vsel %vm812_vm1, %v2990_v8, 0  ;;  %v3020_v44 = vpop.permute.xlu0 %3019  ;;  %v2986_v45 = vpop.permute.xlu1 %2985 }
 0x47f   :  { %v3861_v47 = vpop.f32.mrf.mxu0  ;;  %v3883_v48 = vpop.f32.mrf.mxu1  ;;  %v3184_v46 = vsel %vm812_vm1, %v3020_v44, 0 }
 0x480   :  { %v2756_v56 = vadd.f32 %v3860_v51, %v3504_v52  ;;  %v3136_v48 = vsel %vm812_vm1, %v2988_v21, 0  ;;  %v3133_v51 = vsel %vm812_vm1, %v2986_v45, 0  ;;  %v3561_v52 = vld [vmem:[%s5408_s3 + $0xe] sm:$0xff] }
 0x481   :  { %v3862_v49 = vpop.f32.mrf.mxu0  ;;  %v3884_v50 = vpop.f32.mrf.mxu1 }
 0x482   :  { %v2796_v12 = vadd.f32 %v3882_v9, %v2756_v56  ;;  %v3002_v47 = vpop.permute.xlu0 %3001  ;;  %v3018_v49 = vpop.permute.xlu1 %3017  ;;  %v2893_v56 = vrot.slane %v3561_v52, %v4911_v57 }
 0x483   :  { %v3181_v50 = vsel %vm812_vm1, %v3018_v49, 0 }
 0x4b8   :  { %v2875_v53 = vpop.f32.mrf.mxu1 }
 0x4ba   :  { %v4078_v5 = vpop.f32.mrf.mxu1 }
 0x4bb   :  { %v3902_v6 = vpop.f32.mrf.mxu0  ;;  %v2901_v5 = vrot.slane %v3561_v52, %v4913_v4 }
 0x4bc   :  { %v2878_v10 = vpop.f32.mrf.mxu1 }
 0x4bd   :  { %v3903_v11 = vpop.f32.mrf.mxu0 }
 0x4be   :  { %v3904_v15 = vadd.f32 %v3903_v11, %v3902_v6  ;;  %v4079_v1 = vpop.f32.mrf.mxu1 }
 0x4bf   :  { %v3905_v16 = vpop.f32.mrf.mxu0 }
 0x4c0   :  { %v2836_v17 = vadd.f32 %v3904_v15, %v2796_v12  ;;  %v2905_v16 = vrot.slane %v3561_v52, %v4954_v38 }
 0x4c1   :  { %v3906_v18 = vpop.f32.mrf.mxu0 }
 0x4c2   :  { %v2876_v19 = vadd.f32 %v2875_v53, %v2836_v17  ;;  %v2889_v53 = vrot.slane %v3561_v52, %v4902_v54  ;;  %v2913_v17 = vrot.slane %v3561_v52, %v4952_v37  ;;  %v2909_v18 = vrot.slane %v3561_v52, %v4956_v40 }
 0x4c4   :  { %v2881_v24 = vmax.f32 %v2876_v19, 0.0 }
 0x4c6   :  { %v5326_v26 = vpack.c.bf16 %v2881_v24, %v2881_v24 }
 0x4c8   :  { %3933 = vmatprep.mubr.msk.bf16.mxu0 %vm812_vm1, %v5326_v26  ;;  %3951 = vmatprep.mubr.msk.bf16.mxu1 %vm812_vm1, %v5326_v26 }
 0x4c9   :  { %3934 = vmatmul.mubr.msk.bf16.vlgmr.msra.gmra.mxu0 %vm812_vm1, %v5326_v26  ;;  %3952 = vmatmul.mubr.msk.bf16.vlgmr.msra.gmra.mxu1 %vm812_vm1, %v5326_v26 }
 0x4ca   :  { %3954 = vmatpush3.bf16.xpose.msra.mxu0 %v3154_v30  ;;  %4081 = vmatpush3.bf16.xpose.msra.mxu1 %v3202_v28 }
 0x4cb   :  { %3969 = vmatprep.mubr.msk.bf16.mxu0 %vm812_vm1, %v5326_v26  ;;  %4165 = vmatprep.subr.msk.bf16.mxu0 %vm812_vm1, %v3014_v29 }
 0x4cc   :  { %4082 = vmatprep.subr.bf16.mxu1 %v4370_v39  ;;  %4096 = vmatprep.mubr.msk.bf16.mxu1 %vm4371_vm0, %v4370_v39 }
 0x4d2   :  { %3956 = vmatpush3.bf16.xpose.msra.mxu0 %v3151_v35  ;;  %4083 = vmatpush3.bf16.xpose.msra.mxu1 %v3199_v33 }
 0x4d3   :  { %4166 = vmatprep.subr.msk.bf16.mxu0 %vm812_vm1, %v3012_v34  ;;  %4084 = vmatprep.subr.bf16.mxu1 %v4370_v39 }
 0x4da   :  { %3958 = vmatpush3.bf16.xpose.msra.mxu0 %v3148_v59  ;;  %4085 = vmatpush3.bf16.xpose.msra.mxu1 %v3196_v58 }
 0x4db   :  { %4167 = vmatprep.subr.msk.bf16.mxu0 %vm812_vm1, %v3010_v62  ;;  %4086 = vmatprep.subr.bf16.mxu1 %v4370_v39 }
 0x4e2   :  { %3960 = vmatpush3.bf16.xpose.msra.mxu0 %v3145_v3  ;;  %4087 = vmatpush3.bf16.xpose.msra.mxu1 %v3193_v63 }
 0x4e3   :  { %4168 = vmatprep.subr.msk.bf16.mxu0 %vm812_vm1, %v3008_v2  ;;  %4088 = vmatprep.subr.bf16.mxu1 %v4370_v39 }
 0x4ea   :  { %3962 = vmatpush3.bf16.xpose.msra.mxu0 %v3142_v20  ;;  %4089 = vmatpush3.bf16.xpose.msra.mxu1 %v3190_v13 }
 0x4eb   :  { %4169 = vmatprep.subr.msk.bf16.mxu0 %vm812_vm1, %v3006_v0  ;;  %4090 = vmatprep.subr.bf16.mxu1 %v4370_v39 }
 0x4f2   :  { %3964 = vmatpush3.bf16.xpose.msra.mxu0 %v3139_v43  ;;  %4091 = vmatpush3.bf16.xpose.msra.mxu1 %v3187_v23 }
 0x4f3   :  { %4170 = vmatprep.subr.msk.bf16.mxu0 %vm812_vm1, %v3004_v42  ;;  %4092 = vmatprep.subr.bf16.mxu1 %v4370_v39 }
 0x4fa   :  { %3966 = vmatpush3.bf16.xpose.msra.mxu0 %v3136_v48  ;;  %4093 = vmatpush3.bf16.xpose.msra.mxu1 %v3184_v46 }
 0x4fb   :  { %4171 = vmatprep.subr.msk.bf16.mxu0 %vm812_vm1, %v3002_v47  ;;  %4094 = vmatprep.subr.bf16.mxu1 %v4370_v39  ;;  %v2897_v39 = vrot.slane %v3561_v52, %v4904_v55 }
 0x502   :  { %3968 = vmatpush3.bf16.xpose.msra.mxu0 %v3133_v51  ;;  %4095 = vmatpush3.bf16.xpose.msra.mxu1 %v3181_v50 }
 0x509   :  { %3970 = vmatmul.mubr.msk.bf16.vlgmr.msra.gmra.mxu0 %vm812_vm1, %v5326_v26  ;;  %4097 = vmatmul.mubr.msk.bf16.vlgmr.msra.gmra.mxu1 %vm812_vm1, %v5326_v26 }
 0x589   :  { %v3238_v6 = vpop.f32.mrf.mxu0  ;;  %v3279_v9 = vpop.f32.mrf.mxu1 }
 0x58a   :  { %v3239_v10 = vadd.f32 %v3238_v6, %v2889_v53  ;;  %v3280_v11 = vadd.f32 %v3279_v9, %v2897_v39 }
 0x58b   :  { %v3240_v12 = vpop.f32.mrf.mxu0  ;;  %v3281_v15 = vpop.f32.mrf.mxu1 }
 0x58c   :  { %3367 = vst [vmem:[%s5409_s4] sm:$0xff] %v3239_v10  ;;  %3369 = vst [vmem:[%s5409_s4 + $0x10] sm:$0xff] %v3280_v11  ;;  %v3241_v54 = vadd.f32 %v3240_v12, %v2893_v56  ;;  %v3282_v55 = vadd.f32 %v3281_v15, %v2901_v5 }
 0x58d   :  { %v3242_v1 = vpop.f32.mrf.mxu0  ;;  %v3283_v57 = vpop.f32.mrf.mxu1 }
 0x58e   :  { %3368 = vst [vmem:[%s5409_s4 + $0x8] sm:$0xff] %v3241_v54  ;;  %3370 = vst [vmem:[%s5409_s4 + $0x18] sm:$0xff] %v3282_v55 }
 0x58f   :  { %v3243_v4 = vpop.f32.mrf.mxu0  ;;  %v3284_v14 = vpop.f32.mrf.mxu1 }
 0x5c9   :  { %v3320_v19 = vpop.f32.mrf.mxu0  ;;  %v3361_v24 = vpop.f32.mrf.mxu1 }
 0x5ca   :  { %v3321_v25 = vadd.f32 %v3320_v19, %v2905_v16  ;;  %v3362_v26 = vadd.f32 %v3361_v24, %v2913_v17 }
 0x5cb   :  { %v3322_v27 = vpop.f32.mrf.mxu0  ;;  %v4098_v28 = vpop.f32.mrf.mxu1 }
 0x5cc   :  { %3371 = vst [vmem:[%s5409_s4 + $0x20] sm:$0xff] %v3321_v25  ;;  %3373 = vst [vmem:[%s5409_s4 + $0x30] sm:$0xff] %v3362_v26  ;;  %v3323_v29 = vadd.f32 %v3322_v27, %v2909_v18 }
 0x5cd   :  { %v3324_v38 = vpop.f32.mrf.mxu0  ;;  %v3364_v30 = vpop.f32.mrf.mxu1 }
 0x5ce   :  { %3372 = vst [vmem:[%s5409_s4 + $0x28] sm:$0xff] %v3323_v29 }
 0x5cf   :  { %v3325_v37 = vpop.f32.mrf.mxu0  ;;  %v4099_v40 = vpop.f32.mrf.mxu1 }
 0x5d0   :  { %3378 = vsyncpa [#allocation3], 1 }

</bundles_post_ra>
